<compile_context>
chip_gen: v7x
topology: tpu7x:2x2x1
jax: 0.10.0
libtpu: 0.0.40
codegen_flags: <defaults>
</compile_context>

<pallas_src>
import functools

import jax
import jax.numpy as jnp
from jax.experimental import pallas as pl
from jax.experimental.pallas import tpu as pltpu


def _round_up(x, m):
    return ((x + m - 1) // m) * m


def _pad2(a, rows, cols):
    return jnp.pad(a, ((0, rows - a.shape[0]), (0, cols - a.shape[1])))


def _device_kind():
    try:
        return jax.devices()[0].device_kind.lower()
    except Exception:
        return ""


def _vmem_capacity_bytes():
    try:
        return int(pltpu.get_tpu_info().vmem_capacity_bytes)
    except Exception:
        pass
    kind = _device_kind()
    if "v7" in kind:
        return 64 * 1024 * 1024
    return 128 * 1024 * 1024   # v5e / v6e


def _spec(shape, index_map, *, single_buffered=False):
    """BlockSpec helper; single_buffered=True drops the (wasteful) double buffer
    for blocks whose index map is constant over the whole grid."""
    if single_buffered:
        try:
            return pl.BlockSpec(shape, index_map, pipeline_mode=pl.Buffered(1))
        except Exception:        # pipeline_mode / Buffered unavailable -> default
            pass
    return pl.BlockSpec(shape, index_map)


# --------------------------------------------------------------------------- #
# Kernel A: "resident" path (encoder weight + x batch tile fit VMEM)
#   grid = (batch_tiles [parallel], d_out_tiles [arbitrary])
# --------------------------------------------------------------------------- #
def _vae_resident_kernel(x_ref, we_ref, be_ref, eps_ref, wd_ref, bd_ref,
                         mulv_out, z_out, xout_ref, z_sc, *, dz_pad, cdt):
    j = pl.program_id(1)

    @pl.when(j == 0)
    def _():
        # fused encoder: single MXU dot onto 2*dz_pad lanes, f32 accumulation
        x = x_ref[...].astype(cdt)                       # in-kernel cast, hidden under DMA
        h = jnp.dot(x, we_ref[...], preferred_element_type=jnp.float32) + be_ref[...]
        mulv_out[...] = h.astype(mulv_out.dtype)         # fused [mu | logvar], lane-dense
        mu = h[:, :dz_pad]                               # lane-aligned slices (128-mult)
        lv = h[:, dz_pad:]
        z = mu + jnp.exp(lv * 0.5) * eps_ref[...]        # reparameterization
        z_out[...] = z.astype(z_out.dtype)
        z_sc[...] = z                                    # keep z for the decoder tiles

    # decoder: one lane-dense D_out tile per grid step
    xo = jnp.dot(z_sc[...].astype(cdt), wd_ref[...],
                 preferred_element_type=jnp.float32) + bd_ref[...]
    xout_ref[...] = xo.astype(xout_ref.dtype)


# --------------------------------------------------------------------------- #
# Kernel B: K-tiled fallback (large D_in — encoder contraction streamed)
#   grid = (batch_tiles [parallel], k_tiles [arbitrary])
# --------------------------------------------------------------------------- #
def _vae_ktiled_kernel(x_ref, we_ref, be_ref, eps_ref, wd_ref, bd_ref,
                       mulv_out, z_out, xout_ref, acc_ref, *, dz_pad, cdt, td):
    k = pl.program_id(1)
    nk = pl.num_programs(1)

    @pl.when(k == 0)
    def _():
        acc_ref[...] = jnp.zeros_like(acc_ref)

    x = x_ref[...].astype(cdt)
    acc_ref[...] += jnp.dot(x, we_ref[...], preferred_element_type=jnp.float32)

    @pl.when(k == nk - 1)
    def _():
        h = acc_ref[...] + be_ref[...]
        mulv_out[...] = h.astype(mulv_out.dtype)
        mu = h[:, :dz_pad]
        lv = h[:, dz_pad:]
        z = mu + jnp.exp(lv * 0.5) * eps_ref[...]
        z_out[...] = z.astype(z_out.dtype)
        zc = z.astype(cdt)
        d_out_pad = xout_ref.shape[1]
        # TODO(synk): for D_out too large for a VMEM-resident decoder weight, a
        # separate D_out-tiled decoder grid axis / pallas_call would be needed.
        for j0 in range(0, d_out_pad, td):               # chunked matmul + store
            xo = jnp.dot(zc, wd_ref[:, j0:j0 + td],
                         preferred_element_type=jnp.float32) + bd_ref[:, j0:j0 + td]
            xout_ref[:, j0:j0 + td] = xo.astype(xout_ref.dtype)


# --------------------------------------------------------------------------- #
# Wrapper
# --------------------------------------------------------------------------- #
def basic_vae_forward(x, params, eps, *, compute_dtype=None, recon_dtype=jnp.float32,
                      tm=None, td=None, tk=None, force_k_tiled=False):
    """Pallas-backed BasicVAE.forward (training-mode sampling).

    x      : (N, C, H, W) float32
    params : dict with 'w_enc' (D_in, 2*dz), 'b_enc' (2*dz,),
                       'w_dec' (dz, D_out),  'b_dec' (D_out,)
    eps    : (N, dz) float32 standard-normal sample
    compute_dtype : MXU operand dtype.  None -> bf16 on v5e, f32 elsewhere.
    recon_dtype   : dtype of the reconstruction output (bf16 halves its HBM store).

    Returns (z_mu_logvar, z_sampled, zK_sampled, logabsdetjacT, x_out).
    """
    n, c, h, w = x.shape
    d_in = c * h * w
    dz = params["w_enc"].shape[1] // 2
    d_out = params["w_dec"].shape[1]
    assert d_out == d_in

    kind = _device_kind()
    vmem_cap = _vmem_capacity_bytes()

    # v5e has no native f32 MXU path -> default bf16 operands there.
    if compute_dtype is None:
        compute_dtype = jnp.bfloat16 if ("v5e" in kind or "v5 lite" in kind) else jnp.float32
    cdt = jnp.dtype(compute_dtype)
    cb = cdt.itemsize
    f32 = jnp.float32
    rb = jnp.dtype(recon_dtype).itemsize

    dz_pad = _round_up(dz, 128)          # lane-dense latent outputs
    d_in_pad = _round_up(d_in, 128)
    d_out_pad = _round_up(d_out, 128)

    # batch tile: bf16 packs 16 rows per sublane group; v5e MXU is 128-wide
    row_align = 16 if cdt == jnp.bfloat16 else 8
    if tm is None:
        tm_cap = 128 if "v5" in kind else 256
        tm = min(tm_cap, _round_up(n, row_align))
    tm = max(row_align, _round_up(tm, row_align))
    n_pad = _round_up(n, tm)
    n_tiles = n_pad // tm

    # decoder D_out tile (lane-dense; larger on 128 MiB parts)
    if td is None:
        td_target = 512 if vmem_cap <= 80 * 1024 * 1024 else 1024
        td = 128
        for cand in (2048, 1024, 512, 256, 128):
            if cand <= min(td_target, d_out_pad) and d_out_pad % cand == 0:
                td = cand
                break
    assert d_out_pad % td == 0

    # ---- pack / pad parameters (done once, outside the hot loop) ----
    w_mu = params["w_enc"][:, :dz]
    w_lv = params["w_enc"][:, dz:]
    w_enc_p = jnp.concatenate(
        [_pad2(w_mu, d_in_pad, dz_pad), _pad2(w_lv, d_in_pad, dz_pad)], axis=1
    ).astype(cdt)                                                    # (d_in_pad, 2*dz_pad)
    b_enc_p = jnp.concatenate(
        [_pad2(params["b_enc"][:dz].reshape(1, dz), 1, dz_pad),
         _pad2(params["b_enc"][dz:].reshape(1, dz), 1, dz_pad)], axis=1
    ).astype(f32)                                                    # (1, 2*dz_pad)
    w_dec_p = _pad2(params["w_dec"], dz_pad, d_out_pad).astype(cdt)
    b_dec_p = _pad2(params["b_dec"].reshape(1, d_out), 1, d_out_pad).astype(f32)

    # x / eps stay f32 (cast to the MXU operand dtype inside the kernel)
    x_p = _pad2(x.reshape(n, d_in), n_pad, d_in_pad)
    eps_p = _pad2(eps, n_pad, dz_pad).astype(f32)   # padded lanes 0 -> padded z = 0

    out_shapes = (
        jax.ShapeDtypeStruct((n_pad, 2 * dz_pad), f32),              # [mu | logvar]
        jax.ShapeDtypeStruct((n_pad, dz_pad), f32),                  # z sampled
        jax.ShapeDtypeStruct((n_pad, d_out_pad), jnp.dtype(recon_dtype)),
    )

    cost = pl.CostEstimate(
        flops=int(2 * n_pad * d_in_pad * 2 * dz_pad + 2 * n_pad * dz_pad * d_out_pad),
        transcendentals=int(n_pad * dz_pad),
        bytes_accessed=int(
            n_pad * d_in_pad * 4
            + (d_in_pad * 2 * dz_pad + dz_pad * d_out_pad) * cb
            + (2 * dz_pad + d_out_pad) * 4
            + n_pad * dz_pad * 4
            + n_pad * (3 * dz_pad * 4 + d_out_pad * rb)),
    )

    enc_w_bytes = d_in_pad * 2 * dz_pad * cb
    x_tile_f32 = tm * d_in_pad * 4
    use_resident = (not force_k_tiled
                    and enc_w_bytes <= 8 * 1024 * 1024
                    and 2 * x_tile_f32 + tm * d_in_pad * cb <= 16 * 1024 * 1024)

    if use_resident:
        grid = (n_tiles, d_out_pad // td)
        in_specs = [
            pl.BlockSpec((tm, d_in_pad), lambda i, j: (i, 0)),                       # x
            _spec((d_in_pad, 2 * dz_pad), lambda i, j: (0, 0), single_buffered=True),  # w_enc
            _spec((1, 2 * dz_pad), lambda i, j: (0, 0), single_buffered=True),         # b_enc
            pl.BlockSpec((tm, dz_pad), lambda i, j: (i, 0)),                         # eps
            pl.BlockSpec((dz_pad, td), lambda i, j: (0, j)),                         # w_dec tile
            pl.BlockSpec((1, td), lambda i, j: (0, j)),                              # b_dec tile
        ]
        out_specs = [
            pl.BlockSpec((tm, 2 * dz_pad), lambda i, j: (i, 0)),
            pl.BlockSpec((tm, dz_pad), lambda i, j: (i, 0)),
            pl.BlockSpec((tm, td), lambda i, j: (i, j)),
        ]
        scratch = [pltpu.VMEM((tm, dz_pad), jnp.float32)]                            # z
        kernel = functools.partial(_vae_resident_kernel, dz_pad=dz_pad, cdt=cdt)
        vmem_est = (2 * x_tile_f32 + tm * d_in_pad * cb
                    + enc_w_bytes + 2 * dz_pad * 4
                    + 2 * tm * dz_pad * 4
                    + 2 * (dz_pad * td * cb + td * 4)
                    + 2 * tm * 3 * dz_pad * 4 + 2 * tm * td * rb
                    + tm * dz_pad * 4
                    + tm * (2 * dz_pad + td) * 4)
    else:
        if tk is None:
            tk_target = 2048 if vmem_cap >= 100 * 1024 * 1024 else 512
            tk = 128
            for cand in (2048, 1024, 512, 256, 128):
                if cand <= min(tk_target, d_in_pad) and d_in_pad % cand == 0:
                    tk = cand
                    break
        assert d_in_pad % tk == 0
        grid = (n_tiles, d_in_pad // tk)
        in_specs = [
            pl.BlockSpec((tm, tk), lambda i, k: (i, k)),                             # x
            pl.BlockSpec((tk, 2 * dz_pad), lambda i, k: (k, 0)),                     # w_enc (streamed)
            _spec((1, 2 * dz_pad), lambda i, k: (0, 0), single_buffered=True),        # b_enc
            pl.BlockSpec((tm, dz_pad), lambda i, k: (i, 0)),                         # eps
            _spec((dz_pad, d_out_pad), lambda i, k: (0, 0), single_buffered=True),    # w_dec (resident)
            _spec((1, d_out_pad), lambda i, k: (0, 0), single_buffered=True),         # b_dec
        ]
        out_specs = [
            pl.BlockSpec((tm, 2 * dz_pad), lambda i, k: (i, 0)),
            pl.BlockSpec((tm, dz_pad), lambda i, k: (i, 0)),
            pl.BlockSpec((tm, d_out_pad), lambda i, k: (i, 0)),
        ]
        scratch = [pltpu.VMEM((tm, 2 * dz_pad), jnp.float32)]                        # accumulator
        kernel = functools.partial(_vae_ktiled_kernel, dz_pad=dz_pad, cdt=cdt, td=td)
        vmem_est = (2 * tm * tk * 4 + tm * tk * cb
                    + 2 * tk * 2 * dz_pad * cb + 2 * dz_pad * 4
                    + 2 * tm * dz_pad * 4
                    + dz_pad * d_out_pad * cb + d_out_pad * 4
                    + 2 * tm * 3 * dz_pad * 4 + 2 * tm * d_out_pad * rb
                    + tm * 2 * dz_pad * 4
                    + tm * (2 * dz_pad + td) * 4)

    # VMEM limit: 2x estimate, clamped to the chip's capacity minus headroom.
    vmem_limit = int(min(vmem_cap - 10 * 1024 * 1024,
                         max(32 * 1024 * 1024, 2 * vmem_est)))

    mulv, z_o, xo_flat = pl.pallas_call(
        kernel,
        out_shape=out_shapes,
        grid=grid,
        in_specs=in_specs,
        out_specs=out_specs,
        scratch_shapes=scratch,
        compiler_params=pltpu.CompilerParams(
            dimension_semantics=("parallel", "arbitrary"),
            vmem_limit_bytes=vmem_limit),
        cost_estimate=cost,
    )(x_p, w_enc_p, b_enc_p, eps_p, w_dec_p, b_dec_p)

    # Strip padding and repackage exactly like the PyTorch module.
    z_mu_logvar = jnp.stack([mulv[:n, :dz], mulv[:n, dz_pad:dz_pad + dz]], axis=1)
    z_sampled = z_o[:n, :dz]
    x_out = xo_flat[:n, :d_out].reshape(n, c, h, w)
    logabsdetjacT = jnp.zeros((n, 1), dtype=jnp.float32)              # T = identity
    return z_mu_logvar, z_sampled, z_sampled, logabsdetjacT, x_out


def init_params(key, d_in, dim_z):
    """Deterministic synthetic parameter init (single dense encoder/decoder)."""
    k1, k2, k3, k4 = jax.random.split(key, 4)
    w_enc = jax.random.normal(k1, (d_in, 2 * dim_z), jnp.float32) * (1.0 / jnp.sqrt(d_in))
    b_enc = jax.random.normal(k2, (2 * dim_z,), jnp.float32) * 0.01
    w_dec = jax.random.normal(k3, (dim_z, d_in), jnp.float32) * (1.0 / jnp.sqrt(dim_z))
    b_dec = jax.random.normal(k4, (d_in,), jnp.float32) * 0.01
    return {"w_enc": w_enc, "b_enc": b_enc, "w_dec": w_dec, "b_dec": b_dec}


def _vae_reference(x, params, eps, compute_dtype=jnp.float32):
    """Pure-JAX reference of the same math (same operand dtype, f32 accum)."""
    n, c, h, w = x.shape
    d_in = c * h * w
    dz = params["w_enc"].shape[1] // 2
    cdt = jnp.dtype(compute_dtype)
    x_flat = x.reshape(n, d_in).astype(cdt)
    h_enc = jnp.dot(x_flat, params["w_enc"].astype(cdt),
                    preferred_element_type=jnp.float32) + params["b_enc"]
    mu, lv = h_enc[:, :dz], h_enc[:, dz:]
    z = mu + jnp.exp(lv * 0.5) * eps
    xo = jnp.dot(z.astype(cdt), params["w_dec"].astype(cdt),
                 preferred_element_type=jnp.float32) + params["b_dec"]
    return mu, lv, z, xo.reshape(n, c, h, w)


if __name__ == "__main__":
    # Small shapes: batch=2, channels=4, spatial=16x16, dim_z=32
    N, C, H, W = 2, 4, 16, 16
    DIM_Z = 32
    D_IN = C * H * W

    key = jax.random.PRNGKey(0)
    kx, kp, ke = jax.random.split(key, 3)

    x = jax.random.normal(kx, (N, C, H, W), jnp.float32)
    params = init_params(kp, D_IN, DIM_Z)
    # TODO(synk): eps is drawn host-side (matching torch Normal(...).sample());
    # in-kernel pltpu.prng_random_bits could drop this DMA but breaks bitwise repro.
    eps = jax.random.normal(ke, (N, DIM_Z), jnp.float32)

    mu_r, lv_r, z_r, xo_r = _vae_reference(x, params, eps, jnp.float32)

    def check(outs, atol=1e-4, xatol=1e-3):
        z_ml, z_s, zk_s, ladj, x_out = outs
        assert z_ml.shape == (N, 2, DIM_Z)
        assert jnp.allclose(z_ml[:, 0, :], mu_r, atol=atol)
        assert jnp.allclose(z_ml[:, 1, :], lv_r, atol=atol)
        assert jnp.allclose(z_s, z_r, atol=atol)
        assert jnp.allclose(zk_s, z_s)
        assert jnp.allclose(x_out, xo_r, atol=xatol)
        assert ladj.shape == (N, 1) and jnp.all(ladj == 0.0)

    # 1) resident fast path, f32 MXU operands (matches the fp32 module math)
    outs = basic_vae_forward(x, params, eps, compute_dtype=jnp.float32)
    jax.block_until_ready(outs)
    check(outs)

    # 2) resident path with a small forced decoder tile (exercises D_out tiling)
    outs = basic_vae_forward(x, params, eps, compute_dtype=jnp.float32, td=256)
    jax.block_until_ready(outs)
    check(outs)

    # 3) K-tiled fallback path (large-D_in handling), f32
    outs = basic_vae_forward(x, params, eps, compute_dtype=jnp.float32,
                             force_k_tiled=True, tk=256)
    jax.block_until_ready(outs)
    check(outs)

    # 4) bf16 MXU operands (v6e/v7x fast path; default on v5e), f32 accumulation
    outs_b = basic_vae_forward(x, params, eps, compute_dtype=jnp.bfloat16)
    jax.block_until_ready(outs_b)
    z_ml_b, z_s_b, _, _, x_out_b = outs_b
    mu_b, lv_b, z_b, xo_b = _vae_reference(x, params, eps, jnp.bfloat16)
    assert jnp.allclose(z_ml_b[:, 0, :], mu_b, atol=2e-2, rtol=2e-2)
    assert jnp.allclose(z_s_b, z_b, atol=5e-2, rtol=5e-2)
    assert jnp.allclose(x_out_b, xo_b, atol=1e-1, rtol=5e-2)

    print("KERNEL_OK")
</pallas_src>

<mosaic_0001>
module attributes {stable_mosaic.version = 11 : i64} {
  func.func @_vae_resident_kernel(%arg0: i32, %arg1: i32, %arg2: memref<8x1024xf32, #tpu.memory_space<vmem>>, %arg3: memref<1024x256xf32, #tpu.memory_space<vmem>>, %arg4: memref<1x256xf32, #tpu.memory_space<vmem>>, %arg5: memref<8x128xf32, #tpu.memory_space<vmem>>, %arg6: memref<128x1024xf32, #tpu.memory_space<vmem>>, %arg7: memref<1x1024xf32, #tpu.memory_space<vmem>>, %arg8: memref<8x256xf32, #tpu.memory_space<vmem>>, %arg9: memref<8x128xf32, #tpu.memory_space<vmem>>, %arg10: memref<8x1024xf32, #tpu.memory_space<vmem>>, %arg11: memref<8x128xf32, #tpu.memory_space<vmem>>) attributes {dimension_semantics = [#tpu.dimension_semantics<parallel>, #tpu.dimension_semantics<arbitrary>], iteration_bounds = array<i64: 1, 1>, scalar_prefetch = 0 : i64, scratch_operands = 1 : i64, tpu.core_type = #tpu.core_type<tc>, window_params = [{transform_indices = @transform_0, window_bounds = array<i64: 8, 1024>}, {pipeline_mode = #tpu.pipeline_mode<synchronous>, transform_indices = @transform_1, window_bounds = array<i64: 1024, 256>}, {pipeline_mode = #tpu.pipeline_mode<synchronous>, transform_indices = @transform_2, window_bounds = array<i64: 1, 256>}, {transform_indices = @transform_3, window_bounds = array<i64: 8, 128>}, {transform_indices = @transform_4, window_bounds = array<i64: 128, 1024>}, {transform_indices = @transform_5, window_bounds = array<i64: 1, 1024>}, {transform_indices = @transform_6, window_bounds = array<i64: 8, 256>}, {transform_indices = @transform_7, window_bounds = array<i64: 8, 128>}, {transform_indices = @transform_8, window_bounds = array<i64: 8, 1024>}]} {
    %c0_i32 = arith.constant 0 : i32
    %0 = arith.cmpi eq, %arg1, %c0_i32 : i32
    %1 = arith.extui %0 : i1 to i32
    %c0_i32_0 = arith.constant 0 : i32
    %2 = arith.cmpi ne, %1, %c0_i32_0 : i32
    scf.if %2 {
      %c0_8 = arith.constant 0 : index
      %c0_9 = arith.constant 0 : index
      %10 = vector.load %arg2[%c0_8, %c0_9] : memref<8x1024xf32, #tpu.memory_space<vmem>>, vector<8x1024xf32>
      %c0_10 = arith.constant 0 : index
      %c0_11 = arith.constant 0 : index
      %11 = vector.load %arg3[%c0_10, %c0_11] : memref<1024x256xf32, #tpu.memory_space<vmem>>, vector<1024x256xf32>
      %cst_12 = arith.constant dense<0.000000e+00> : vector<8x256xf32>
      %12 = tpu.matmul %10, %11, %cst_12 {dimension_numbers = #tpu.dot_dimension_numbers<[1], [0], [0], [1], [0, 0, 1, 1], [], []>} : vector<8x1024xf32>, vector<1024x256xf32>, vector<8x256xf32> -> vector<8x256xf32>
      %c0_13 = arith.constant 0 : index
      %c0_14 = arith.constant 0 : index
      %13 = vector.load %arg4[%c0_13, %c0_14] : memref<1x256xf32, #tpu.memory_space<vmem>>, vector<1x256xf32>
      %14 = vector.broadcast %13 : vector<1x256xf32> to vector<8x256xf32>
      %15 = arith.addf %12, %14 : vector<8x256xf32>
      %c0_15 = arith.constant 0 : index
      %c0_16 = arith.constant 0 : index
      %16 = vector.load %arg8[%c0_15, %c0_16] : memref<8x256xf32, #tpu.memory_space<vmem>>, vector<8x256xf32>
      tpu.vector_store %arg8[%c0_15, %c0_16], %15 {strides = array<i32>} : memref<8x256xf32, #tpu.memory_space<vmem>>, vector<8x256xf32>,
      %17 = vector.extract_strided_slice %15 {offsets = [0, 0], sizes = [8, 128], strides = [1, 1]} : vector<8x256xf32> to vector<8x128xf32>
      %18 = vector.extract_strided_slice %15 {offsets = [0, 128], sizes = [8, 128], strides = [1, 1]} : vector<8x256xf32> to vector<8x128xf32>
      %cst_17 = arith.constant 5.000000e-01 : f32
      %19 = vector.broadcast %cst_17 : f32 to vector<8x128xf32>
      %20 = arith.mulf %18, %19 : vector<8x128xf32>
      %21 = math.exp %20 : vector<8x128xf32>
      %c0_18 = arith.constant 0 : index
      %c0_19 = arith.constant 0 : index
      %22 = vector.load %arg5[%c0_18, %c0_19] : memref<8x128xf32, #tpu.memory_space<vmem>>, vector<8x128xf32>
      %23 = arith.mulf %21, %22 : vector<8x128xf32>
      %24 = arith.addf %17, %23 : vector<8x128xf32>
      %c0_20 = arith.constant 0 : index
      %c0_21 = arith.constant 0 : index
      %25 = vector.load %arg9[%c0_20, %c0_21] : memref<8x128xf32, #tpu.memory_space<vmem>>, vector<8x128xf32>
      tpu.vector_store %arg9[%c0_20, %c0_21], %24 {strides = array<i32>} : memref<8x128xf32, #tpu.memory_space<vmem>>, vector<8x128xf32>,
      %c0_22 = arith.constant 0 : index
      %c0_23 = arith.constant 0 : index
      %26 = vector.load %arg11[%c0_22, %c0_23] : memref<8x128xf32, #tpu.memory_space<vmem>>, vector<8x128xf32>
      tpu.vector_store %arg11[%c0_22, %c0_23], %24 {strides = array<i32>} : memref<8x128xf32, #tpu.memory_space<vmem>>, vector<8x128xf32>,
    } else {
    }
    %c0 = arith.constant 0 : index
    %c0_1 = arith.constant 0 : index
    %3 = vector.load %arg11[%c0, %c0_1] : memref<8x128xf32, #tpu.memory_space<vmem>>, vector<8x128xf32>
    %c0_2 = arith.constant 0 : index
    %c0_3 = arith.constant 0 : index
    %4 = vector.load %arg6[%c0_2, %c0_3] : memref<128x1024xf32, #tpu.memory_space<vmem>>, vector<128x1024xf32>
    %cst = arith.constant dense<0.000000e+00> : vector<8x1024xf32>
    %5 = tpu.matmul %3, %4, %cst {dimension_numbers = #tpu.dot_dimension_numbers<[1], [0], [0], [1], [0, 0, 1, 1], [], []>} : vector<8x128xf32>, vector<128x1024xf32>, vector<8x1024xf32> -> vector<8x1024xf32>
    %c0_4 = arith.constant 0 : index
    %c0_5 = arith.constant 0 : index
    %6 = vector.load %arg7[%c0_4, %c0_5] : memref<1x1024xf32, #tpu.memory_space<vmem>>, vector<1x1024xf32>
    %7 = vector.broadcast %6 : vector<1x1024xf32> to vector<8x1024xf32>
    %8 = arith.addf %5, %7 : vector<8x1024xf32>
    %c0_6 = arith.constant 0 : index
    %c0_7 = arith.constant 0 : index
    %9 = vector.load %arg10[%c0_6, %c0_7] : memref<8x1024xf32, #tpu.memory_space<vmem>>, vector<8x1024xf32>
    tpu.vector_store %arg10[%c0_6, %c0_7], %8 {strides = array<i32>} : memref<8x1024xf32, #tpu.memory_space<vmem>>, vector<8x1024xf32>,
    return
  }
  func.func @transform_0(%arg0: i32, %arg1: i32) -> (i32, i32) {
    %c0_i32 = arith.constant 0 : i32
    %c0_i32_0 = arith.constant 0 : i32
    return %arg0, %c0_i32 : i32, i32
  }
  func.func @transform_1(%arg0: i32, %arg1: i32) -> (i32, i32) {
    %c0_i32 = arith.constant 0 : i32
    %c0_i32_0 = arith.constant 0 : i32
    %c0_i32_1 = arith.constant 0 : i32
    return %c0_i32, %c0_i32_0 : i32, i32
  }
  func.func @transform_2(%arg0: i32, %arg1: i32) -> (i32, i32) {
    %c0_i32 = arith.constant 0 : i32
    %c0_i32_0 = arith.constant 0 : i32
    %c0_i32_1 = arith.constant 0 : i32
    return %c0_i32, %c0_i32_0 : i32, i32
  }
  func.func @transform_3(%arg0: i32, %arg1: i32) -> (i32, i32) {
    %c0_i32 = arith.constant 0 : i32
    %c0_i32_0 = arith.constant 0 : i32
    return %arg0, %c0_i32 : i32, i32
  }
  func.func @transform_4(%arg0: i32, %arg1: i32) -> (i32, i32) {
    %c0_i32 = arith.constant 0 : i32
    %c0_i32_0 = arith.constant 0 : i32
    return %c0_i32, %arg1 : i32, i32
  }
  func.func @transform_5(%arg0: i32, %arg1: i32) -> (i32, i32) {
    %c0_i32 = arith.constant 0 : i32
    %c0_i32_0 = arith.constant 0 : i32
    return %c0_i32, %arg1 : i32, i32
  }
  func.func @transform_6(%arg0: i32, %arg1: i32) -> (i32, i32) {
    %c0_i32 = arith.constant 0 : i32
    %c0_i32_0 = arith.constant 0 : i32
    return %arg0, %c0_i32 : i32, i32
  }
  func.func @transform_7(%arg0: i32, %arg1: i32) -> (i32, i32) {
    %c0_i32 = arith.constant 0 : i32
    %c0_i32_0 = arith.constant 0 : i32
    return %arg0, %c0_i32 : i32, i32
  }
  func.func @transform_8(%arg0: i32, %arg1: i32) -> (i32, i32) {
    %c0_i32 = arith.constant 0 : i32
    return %arg0, %arg1 : i32, i32
  }
}

</mosaic_0001>

<bundles_post_ra>
// kernel: tpu_custom_call.1
= control target key start
LH: loop header
LB: loop body
LE: loop exit
PB: predicated region body
PF: predicated region fallthrough
CT: control target
= control target key end

     0   :  { %14 = vsyncpa [#allocation4], 0  ;;  %s1858_s0 = inlined_call_operand.hbm [shape: f32[8,1024], index: 0, kind: input, shape index: {}]   ;;  %s1859_s1 = inlined_call_operand.hbm [shape: f32[1024,256], index: 1, kind: input, shape index: {}]   ;;  %s1860_s2 = inlined_call_operand.vmem [shape: f32[1,256], index: 2, kind: input, shape index: {}]   ;;  %s1861_s3 = inlined_call_operand.vmem [shape: f32[8,128], index: 3, kind: input, shape index: {}]   ;;  %s1862_s4 = inlined_call_operand.hbm [shape: f32[128,1024], index: 4, kind: input, shape index: {}]   ;;  %s1863_s5 = inlined_call_operand.vmem [shape: f32[1,1024], index: 5, kind: input, shape index: {}]   ;;  %s1864_s6 = inlined_call_operand.hbm [shape: f32[8,256], index: 6, kind: output, shape index: {0}]   ;;  %s1865_s7 = inlined_call_operand.hbm [shape: f32[8,128], index: 7, kind: output, shape index: {1}]   ;;  %s1866_s8 = inlined_call_operand.hbm [shape: f32[8,1024], index: 8, kind: output, shape index: {2}]  }
   0x1   :  { %15 = vsyncpa [#allocation7], 0 }
   0x2   :  { %16 = vsyncpa [#allocation5], 0 }
   0x3   :  { %17 = vsyncpa [#allocation11], 0  ;;  %s1692_s27 = smov [#allocation6]   ;;  %s1552_s9 = scalar_lea.hbm %s1859_s1, 32768 }
   0x4   :  { %s33_s28 = sshll.u32 %s1692_s27, 4  ;;  %p1553_p0 = scmp.ne.s32.totalorder %s1859_s1, %s1552_s9  ;;  %s34_s28 = int_to_ptr.vmem [resolvable:$true] %s33_s28 }
   0x5   :  { %p1556_p1 = scmp.lt.u32.totalorder %s1552_s9, %s1859_s1 }
   0x7   :  { %p1558_p2 = pnand %p1556_p1, %p1553_p0 }
   0x9   :  { %1561 = shalt.err (!%p1558_p2)
}
   0xa   :  { %s1562_s14 = scalar_lea.vmem %s34_s28, 32768  ;;  %p1567_p4 = scmp.lt.s32.totalorder %s34_s28, %s34_s28 }
   0xb   :  { %p1563_p3 = scmp.ne.s32.totalorder %s34_s28, %s1562_s14  ;;  %p1568_p5 = scmp.lt.s32.totalorder %s1562_s14, %s1562_s14 }
   0xd   :  { %p1569_p6 = por %p1568_p5, %p1567_p4 }
   0xf   :  { %p1570_p7 = pnand %p1569_p6, %p1563_p3 }
  0x11   :  { %1573 = shalt.err (!%p1570_p7)
}
  0x12   :  { %s1693_s15 = smov 256   ;;  %s1694_s16 = smov 16  }
  0x13   :  { %39 = dma.hbm_to_vmem [thread:$0]  %s1859_s1, 32768, %s34_s28, [#allocation7], %s1693_s15, %s1693_s15, %s1694_s16  }
  0x14   :  { %s1695_s19 = smov [#allocation3]   ;;  %s1696_s21 = smov [#allocation8]  }
  0x15   :  { %s24_s20 = sshll.u32 %s1695_s19, 4  ;;  %s49_s22 = sshll.u32 %s1696_s21, 4  ;;  %s25_s20 = int_to_ptr.vmem [resolvable:$true] %s24_s20  ;;  %s50_s22 = int_to_ptr.vmem [resolvable:$true] %s49_s22 }
  0x16   :  { %s1574_s25 = scalar_lea.hbm %s1858_s0, 1024 }
  0x17   :  { %p1575_p8 = scmp.ne.s32.totalorder %s1858_s0, %s1574_s25  ;;  %p1578_p9 = scmp.lt.u32.totalorder %s1574_s25, %s1858_s0 }
  0x19   :  { %p1580_p10 = pnand %p1578_p9, %p1575_p8 }
  0x1b   :  { %1583 = shalt.err (!%p1580_p10)
}
  0x1c   :  { %s1584_s1 = scalar_lea.vmem %s25_s20, 1024  ;;  %p1589_p12 = scmp.lt.s32.totalorder %s25_s20, %s25_s20 }
  0x1d   :  { %p1585_p11 = scmp.ne.s32.totalorder %s25_s20, %s1584_s1  ;;  %p1590_p13 = scmp.lt.s32.totalorder %s1584_s1, %s1584_s1 }
  0x1f   :  { %p1591_p0 = por %p1590_p13, %p1589_p12 }
  0x21   :  { %p1592_p1 = pnand %p1591_p0, %p1585_p11 }
  0x23   :  { %1595 = shalt.err (!%p1592_p1)
}
  0x24   :  { %27 = dma.hbm_to_vmem [thread:$0]  %s1858_s0, 1024, %s25_s20, [#allocation4]  }
  0x25   :  { %s1596_s12 = scalar_lea.hbm %s1862_s4, 16384 }
  0x26   :  { %p1597_p2 = scmp.ne.s32.totalorder %s1862_s4, %s1596_s12  ;;  %p1600_p3 = scmp.lt.u32.totalorder %s1596_s12, %s1862_s4 }
  0x28   :  { %p1602_p4 = pnand %p1600_p3, %p1597_p2 }
  0x2a   :  { %1605 = shalt.err (!%p1602_p4)
}
  0x2b   :  { %s1606_s17 = scalar_lea.vmem %s50_s22, 16384  ;;  %p1611_p6 = scmp.lt.s32.totalorder %s50_s22, %s50_s22 }
  0x2c   :  { %p1607_p5 = scmp.ne.s32.totalorder %s50_s22, %s1606_s17  ;;  %p1612_p7 = scmp.lt.s32.totalorder %s1606_s17, %s1606_s17 }
  0x2e   :  { %p1613_p8 = por %p1612_p7, %p1611_p6 }
  0x30   :  { %p1614_p9 = pnand %p1613_p8, %p1607_p5 }
  0x32   :  { %1617 = shalt.err (!%p1614_p9)
}
  0x33   :  { %s1697_s0 = smov 1024   ;;  %s1698_s18 = smov 64  }
  0x34   :  { %55 = dma.hbm_to_vmem [thread:$0]  %s1862_s4, 16384, %s50_s22, [#allocation7], %s1697_s0, %s1697_s0, %s1698_s18  }
  0x35   :  { %1684 = dma.done.wait [#allocation4], 1024  }
  0x36   :  { %1685 = vsyncadd [#allocation4], 4294966272 }
  0x37   :  { %1686 = dma.done.wait [#allocation7], 49152  }
  0x38   :  { %1687 = vsyncadd [#allocation7], 4294918144  ;;  %v144_v0 = vld [vmem:[#allocation6 + $0x208] sm:$0xff]  ;;  %v146_v1 = vld [vmem:[#allocation6 + $0x218] sm:$0xff]  ;;  %s1701_s24 = smov [#allocation9]  }
  0x39   :  { %v143_v2 = vld [vmem:[#allocation6 + $0x200] sm:$0xff]  ;;  %v1211_v3 = vpack.c.bf16 %v146_v1, %v144_v0  ;;  %v145_v4 = vld [vmem:[#allocation6 + $0x210] sm:$0xff]  ;;  %v148_v5 = vld [vmem:[#allocation6 + $0x228] sm:$0xff]  ;;  %s1110_s25 = sshll.u32 %s1701_s24, 4  ;;  %s1111_s25 = int_to_ptr.vmem [resolvable:$true] %s1110_s25 }
  0x3a   :  { %v150_v6 = vld [vmem:[#allocation6 + $0x238] sm:$0xff]  ;;  %v1213_v7 = vpack.c.bf16 %v145_v4, %v143_v2  ;;  %v147_v9 = vld [vmem:[#allocation6 + $0x220] sm:$0xff]  ;;  %v149_v10 = vld [vmem:[#allocation6 + $0x230] sm:$0xff] }
  0x3b   :  { %v1215_v8 = vpack.c.bf16 %v150_v6, %v148_v5  ;;  %v152_v11 = vld [vmem:[#allocation6 + $0x248] sm:$0xff]  ;;  %1212 = vmatprep.subr.bf16.mxu0 %v1211_v3  ;;  %v154_v12 = vld [vmem:[#allocation6 + $0x258] sm:$0xff]  ;;  %v1217_v13 = vpack.c.bf16 %v149_v10, %v147_v9  ;;  %v151_v15 = vld [vmem:[#allocation6 + $0x240] sm:$0xff] }
  0x3c   :  { %1214 = vmatpush1.bf16.msra.mxu0 %v1213_v7  ;;  %v1219_v14 = vpack.c.bf16 %v154_v12, %v152_v11  ;;  %v153_v16 = vld [vmem:[#allocation6 + $0x250] sm:$0xff]  ;;  %v156_v17 = vld [vmem:[#allocation6 + $0x268] sm:$0xff]  ;;  %v158_v18 = vld [vmem:[#allocation6 + $0x278] sm:$0xff] }
  0x3d   :  { %1216 = vmatprep.subr.bf16.mxu0 %v1215_v8  ;;  %v1221_v19 = vpack.c.bf16 %v153_v16, %v151_v15  ;;  %v1223_v20 = vpack.c.bf16 %v158_v18, %v156_v17  ;;  %v155_v21 = vld [vmem:[#allocation6 + $0x260] sm:$0xff]  ;;  %v157_v22 = vld [vmem:[#allocation6 + $0x270] sm:$0xff]  ;;  %v160_v23 = vld [vmem:[#allocation6 + $0x288] sm:$0xff] }
  0x3e   :  { %v162_v24 = vld [vmem:[#allocation6 + $0x298] sm:$0xff]  ;;  %v1225_v25 = vpack.c.bf16 %v157_v22, %v155_v21  ;;  %v159_v27 = vld [vmem:[#allocation6 + $0x280] sm:$0xff]  ;;  %v161_v28 = vld [vmem:[#allocation6 + $0x290] sm:$0xff] }
  0x3f   :  { %v1227_v26 = vpack.c.bf16 %v162_v24, %v160_v23  ;;  %v164_v29 = vld [vmem:[#allocation6 + $0x2a8] sm:$0xff]  ;;  %v166_v30 = vld [vmem:[#allocation6 + $0x2b8] sm:$0xff]  ;;  %v1229_v31 = vpack.c.bf16 %v161_v28, %v159_v27  ;;  %v163_v33 = vld [vmem:[#allocation6 + $0x2a0] sm:$0xff] }
  0x40   :  { %1218 = vmatpush1.bf16.msra.mxu0 %v1217_v13  ;;  %v1231_v32 = vpack.c.bf16 %v166_v30, %v164_v29  ;;  %v165_v34 = vld [vmem:[#allocation6 + $0x2b0] sm:$0xff]  ;;  %v168_v35 = vld [vmem:[#allocation6 + $0x2c8] sm:$0xff]  ;;  %v170_v36 = vld [vmem:[#allocation6 + $0x2d8] sm:$0xff] }
  0x41   :  { %1220 = vmatprep.subr.bf16.mxu0 %v1219_v14  ;;  %v1233_v37 = vpack.c.bf16 %v165_v34, %v163_v33  ;;  %v1235_v38 = vpack.c.bf16 %v170_v36, %v168_v35  ;;  %v167_v39 = vld [vmem:[#allocation6 + $0x2c0] sm:$0xff]  ;;  %v169_v40 = vld [vmem:[#allocation6 + $0x2d0] sm:$0xff]  ;;  %v74_v41 = vld [vmem:[#allocation3 + $0x18] sm:$0xff] }
  0x42   :  { %v172_v42 = vld [vmem:[#allocation6 + $0x2e8] sm:$0xff]  ;;  %v174_v43 = vld [vmem:[#allocation6 + $0x2f8] sm:$0xff]  ;;  %482 = vmatprep.mubr.f32.mxu0 %v74_v41  ;;  %v1237_v44 = vpack.c.bf16 %v169_v40, %v167_v39  ;;  %v171_v46 = vld [vmem:[#allocation6 + $0x2e0] sm:$0xff] }
  0x43   :  { %v1239_v45 = vpack.c.bf16 %v174_v43, %v172_v42  ;;  %v173_v47 = vld [vmem:[#allocation6 + $0x2f0] sm:$0xff]  ;;  %v176_v48 = vld [vmem:[#allocation6 + $0x308] sm:$0xff]  ;;  %v178_v49 = vld [vmem:[#allocation6 + $0x318] sm:$0xff] }
  0x44   :  { %1222 = vmatpush1.bf16.msra.mxu0 %v1221_v19  ;;  %v1241_v50 = vpack.c.bf16 %v173_v47, %v171_v46  ;;  %v1243_v51 = vpack.c.bf16 %v178_v49, %v176_v48  ;;  %v175_v52 = vld [vmem:[#allocation6 + $0x300] sm:$0xff]  ;;  %v177_v53 = vld [vmem:[#allocation6 + $0x310] sm:$0xff]  ;;  %v180_v54 = vld [vmem:[#allocation6 + $0x328] sm:$0xff] }
  0x45   :  { %1224 = vmatprep.subr.bf16.mxu0 %v1223_v20  ;;  %v182_v55 = vld [vmem:[#allocation6 + $0x338] sm:$0xff]  ;;  %v1245_v56 = vpack.c.bf16 %v177_v53, %v175_v52  ;;  %v179_v58 = vld [vmem:[#allocation6 + $0x320] sm:$0xff]  ;;  %v181_v59 = vld [vmem:[#allocation6 + $0x330] sm:$0xff] }
  0x46   :  { %v1247_v57 = vpack.c.bf16 %v182_v55, %v180_v54  ;;  %v184_v60 = vld [vmem:[#allocation6 + $0x348] sm:$0xff]  ;;  %v186_v61 = vld [vmem:[#allocation6 + $0x358] sm:$0xff]  ;;  %v1249_v62 = vpack.c.bf16 %v181_v59, %v179_v58  ;;  %v183_v0 = vld [vmem:[#allocation6 + $0x340] sm:$0xff] }
  0x47   :  { %v1251_v63 = vpack.c.bf16 %v186_v61, %v184_v60  ;;  %v185_v1 = vld [vmem:[#allocation6 + $0x350] sm:$0xff]  ;;  %v188_v2 = vld [vmem:[#allocation6 + $0x368] sm:$0xff]  ;;  %v190_v3 = vld [vmem:[#allocation6 + $0x378] sm:$0xff] }
  0x48   :  { %1226 = vmatpush1.bf16.msra.mxu0 %v1225_v25  ;;  %v1253_v4 = vpack.c.bf16 %v185_v1, %v183_v0  ;;  %v1255_v5 = vpack.c.bf16 %v190_v3, %v188_v2  ;;  %v187_v6 = vld [vmem:[#allocation6 + $0x360] sm:$0xff]  ;;  %v189_v7 = vld [vmem:[#allocation6 + $0x370] sm:$0xff]  ;;  %v192_v8 = vld [vmem:[#allocation6 + $0x388] sm:$0xff] }
  0x49   :  { %1228 = vmatprep.subr.bf16.mxu0 %v1227_v26  ;;  %v194_v9 = vld [vmem:[#allocation6 + $0x398] sm:$0xff]  ;;  %v80_v10 = vld [vmem:[#allocation6 + $0x8] sm:$0xff]  ;;  %v1257_v12 = vpack.c.bf16 %v189_v7, %v187_v6  ;;  %v79_v14 = vld [vmem:[#allocation6] sm:$0xff] }
  0x4a   :  { %v82_v11 = vld [vmem:[#allocation6 + $0x18] sm:$0xff]  ;;  %v81_v15 = vld [vmem:[#allocation6 + $0x10] sm:$0xff]  ;;  %v1259_v16 = vpack.c.bf16 %v194_v9, %v192_v8  ;;  %v191_v17 = vld [vmem:[#allocation6 + $0x380] sm:$0xff] }
  0x4b   :  { %v1147_v13 = vpack.c.bf16 %v82_v11, %v80_v10  ;;  %v193_v18 = vld [vmem:[#allocation6 + $0x390] sm:$0xff]  ;;  %v1149_v19 = vpack.c.bf16 %v81_v15, %v79_v14  ;;  %v84_v20 = vld [vmem:[#allocation6 + $0x28] sm:$0xff]  ;;  %v198_v22 = vld [vmem:[#allocation6 + $0x3b8] sm:$0xff] }
  0x4c   :  { %1230 = vmatpush1.bf16.msra.mxu0 %v1229_v31  ;;  %v196_v21 = vld [vmem:[#allocation6 + $0x3a8] sm:$0xff]  ;;  %v86_v23 = vld [vmem:[#allocation6 + $0x38] sm:$0xff]  ;;  %v83_v25 = vld [vmem:[#allocation6 + $0x20] sm:$0xff]  ;;  %v1261_v27 = vpack.c.bf16 %v193_v18, %v191_v17 }
  0x4d   :  { %1232 = vmatprep.subr.bf16.mxu0 %v1231_v32  ;;  %1148 = vmatprep.subr.bf16.mxu1 %v1147_v13  ;;  %v1151_v24 = vpack.c.bf16 %v86_v23, %v84_v20  ;;  %v85_v26 = vld [vmem:[#allocation6 + $0x30] sm:$0xff]  ;;  %v195_v28 = vld [vmem:[#allocation6 + $0x3a0] sm:$0xff]  ;;  %v88_v30 = vld [vmem:[#allocation6 + $0x48] sm:$0xff]  ;;  %v1263_v31 = vpack.c.bf16 %v198_v22, %v196_v21 }
  0x4e   :  { %1150 = vmatpush1.bf16.msra.mxu1 %v1149_v19  ;;  %v1153_v29 = vpack.c.bf16 %v85_v26, %v83_v25  ;;  %v197_v32 = vld [vmem:[#allocation6 + $0x3b0] sm:$0xff]  ;;  %v200_v33 = vld [vmem:[#allocation6 + $0x3c8] sm:$0xff]  ;;  %v90_v34 = vld [vmem:[#allocation6 + $0x58] sm:$0xff] }
  0x4f   :  { %1152 = vmatprep.subr.bf16.mxu1 %v1151_v24  ;;  %v202_v35 = vld [vmem:[#allocation6 + $0x3d8] sm:$0xff]  ;;  %v1155_v36 = vpack.c.bf16 %v90_v34, %v88_v30  ;;  %v92_v40 = vld [vmem:[#allocation6 + $0x68] sm:$0xff]  ;;  %v1265_v42 = vpack.c.bf16 %v197_v32, %v195_v28  ;;  %v199_v43 = vld [vmem:[#allocation6 + $0x3c0] sm:$0xff] }
  0x50   :  { %1234 = vmatpush1.bf16.msra.mxu0 %v1233_v37  ;;  %v87_v37 = vld [vmem:[#allocation6 + $0x40] sm:$0xff]  ;;  %v94_v41 = vld [vmem:[#allocation6 + $0x78] sm:$0xff]  ;;  %v1267_v46 = vpack.c.bf16 %v202_v35, %v200_v33  ;;  %v201_v47 = vld [vmem:[#allocation6 + $0x3d0] sm:$0xff] }
  0x51   :  { %1236 = vmatprep.subr.bf16.mxu0 %v1235_v38  ;;  %v89_v38 = vld [vmem:[#allocation6 + $0x50] sm:$0xff]  ;;  %v204_v48 = vld [vmem:[#allocation6 + $0x3e8] sm:$0xff]  ;;  %v98_v52 = vld [vmem:[#allocation6 + $0x98] sm:$0xff]  ;;  %v1269_v54 = vpack.c.bf16 %v201_v47, %v199_v43 }
  0x52   :  { %1154 = vmatpush1.bf16.msra.mxu1 %v1153_v29  ;;  %v1157_v39 = vpack.c.bf16 %v89_v38, %v87_v37  ;;  %v93_v49 = vld [vmem:[#allocation6 + $0x70] sm:$0xff]  ;;  %v203_v55 = vld [vmem:[#allocation6 + $0x3e0] sm:$0xff]  ;;  %v100_v61 = vld [vmem:[#allocation6 + $0xa8] sm:$0xff] }
  0x53   :  { %1156 = vmatprep.subr.bf16.mxu1 %v1155_v36  ;;  %v97_v58 = vld [vmem:[#allocation6 + $0x90] sm:$0xff]  ;;  %v210_v0 = vld [vmem:[#allocation6 + $0x418] sm:$0xff]  ;;  %v207_v7 = vld [vmem:[#allocation6 + $0x400] sm:$0xff] }
  0x54   :  { %1238 = vmatpush1.bf16.msra.mxu0 %v1237_v44  ;;  %v1159_v44 = vpack.c.bf16 %v94_v41, %v92_v40  ;;  %v205_v60 = vld [vmem:[#allocation6 + $0x3f0] sm:$0xff]  ;;  %v212_v9 = vld [vmem:[#allocation6 + $0x428] sm:$0xff]  ;;  %v214_v10 = vld [vmem:[#allocation6 + $0x438] sm:$0xff] }
  0x55   :  { %1240 = vmatprep.subr.bf16.mxu0 %v1239_v45  ;;  %v91_v45 = vld [vmem:[#allocation6 + $0x60] sm:$0xff]  ;;  %v1273_v2 = vpack.c.bf16 %v205_v60, %v203_v55  ;;  %v209_v8 = vld [vmem:[#allocation6 + $0x410] sm:$0xff]  ;;  %v104_v11 = vld [vmem:[#allocation6 + $0xc8] sm:$0xff]  ;;  %v1279_v20 = vpack.c.bf16 %v214_v10, %v212_v9 }
  0x56   :  { %1158 = vmatpush1.bf16.msra.mxu1 %v1157_v39  ;;  %v1161_v53 = vpack.c.bf16 %v93_v49, %v91_v45  ;;  %v73_v13 = vld [vmem:[#allocation3 + $0x10] sm:$0xff]  ;;  %v211_v14 = vld [vmem:[#allocation6 + $0x420] sm:$0xff]  ;;  %v76_v21 = vld [vmem:[#allocation3 + $0x28] sm:$0xff] }
  0x57   :  { %1160 = vmatprep.subr.bf16.mxu1 %v1159_v44  ;;  %v213_v17 = vld [vmem:[#allocation6 + $0x430] sm:$0xff]  ;;  %v103_v18 = vld [vmem:[#allocation6 + $0xc0] sm:$0xff]  ;;  %v108_v23 = vld [vmem:[#allocation6 + $0xe8] sm:$0xff] }
  0x58   :  { %1242 = vmatpush1.bf16.msra.mxu0 %v1241_v50  ;;  %v206_v50 = vld [vmem:[#allocation6 + $0x3f8] sm:$0xff]  ;;  %v105_v19 = vld [vmem:[#allocation6 + $0xd0] sm:$0xff]  ;;  %v216_v25 = vld [vmem:[#allocation6 + $0x448] sm:$0xff]  ;;  %v1281_v28 = vpack.c.bf16 %v213_v17, %v211_v14 }
  0x59   :  { %1244 = vmatprep.subr.bf16.mxu0 %v1243_v51  ;;  %v96_v51 = vld [vmem:[#allocation6 + $0x88] sm:$0xff]  ;;  %v1271_v59 = vpack.c.bf16 %v206_v50, %v204_v48  ;;  %v110_v24 = vld [vmem:[#allocation6 + $0xf8] sm:$0xff]  ;;  %v215_v29 = vld [vmem:[#allocation6 + $0x440] sm:$0xff] }
  0x5a   :  { %1162 = vmatpush1.bf16.msra.mxu1 %v1161_v53  ;;  %v218_v26 = vld [vmem:[#allocation6 + $0x458] sm:$0xff]  ;;  %v1175_v30 = vpack.c.bf16 %v110_v24, %v108_v23  ;;  %v109_v32 = vld [vmem:[#allocation6 + $0xf0] sm:$0xff]  ;;  %v112_v35 = vld [vmem:[#allocation6 + $0x108] sm:$0xff] }
  0x5b   :  { %v1283_v33 = vpack.c.bf16 %v218_v26, %v216_v25  ;;  %v217_v34 = vld [vmem:[#allocation6 + $0x450] sm:$0xff]  ;;  %v114_v36 = vld [vmem:[#allocation6 + $0x118] sm:$0xff]  ;;  %v220_v37 = vld [vmem:[#allocation6 + $0x468] sm:$0xff] }
  0x5c   :  { %1246 = vmatpush1.bf16.msra.mxu0 %v1245_v56  ;;  %v1163_v56 = vpack.c.bf16 %v98_v52, %v96_v51  ;;  %v222_v38 = vld [vmem:[#allocation6 + $0x478] sm:$0xff]  ;;  %v1285_v40 = vpack.c.bf16 %v217_v34, %v215_v29  ;;  %v219_v41 = vld [vmem:[#allocation6 + $0x460] sm:$0xff]  ;;  %v113_v44 = vld [vmem:[#allocation6 + $0x110] sm:$0xff] }
  0x5d   :  { %1248 = vmatprep.subr.bf16.mxu0 %v1247_v57  ;;  %v95_v57 = vld [vmem:[#allocation6 + $0x80] sm:$0xff]  ;;  %v1287_v45 = vpack.c.bf16 %v222_v38, %v220_v37  ;;  %v116_v47 = vld [vmem:[#allocation6 + $0x128] sm:$0xff]  ;;  %v118_v48 = vld [vmem:[#allocation6 + $0x138] sm:$0xff] }
  0x5e   :  { %v1165_v1 = vpack.c.bf16 %v97_v58, %v95_v57  ;;  %1164 = vmatprep.subr.bf16.mxu1 %v1163_v56  ;;  %v111_v43 = vld [vmem:[#allocation6 + $0x100] sm:$0xff]  ;;  %v224_v49 = vld [vmem:[#allocation6 + $0x488] sm:$0xff]  ;;  %v226_v50 = vld [vmem:[#allocation6 + $0x498] sm:$0xff] }
  0x5f   :  { %v1181_v51 = vpack.c.bf16 %v113_v44, %v111_v43  ;;  %v223_v53 = vld [vmem:[#allocation6 + $0x480] sm:$0xff]  ;;  %v117_v56 = vld [vmem:[#allocation6 + $0x130] sm:$0xff]  ;;  %v1291_v57 = vpack.c.bf16 %v226_v50, %v224_v49  ;;  %v122_v60 = vld [vmem:[#allocation6 + $0x158] sm:$0xff] }
  0x60   :  { %1250 = vmatpush1.bf16.msra.mxu0 %v1249_v62  ;;  %v102_v62 = vld [vmem:[#allocation6 + $0xb8] sm:$0xff]  ;;  %1166 = vmatpush1.bf16.msra.mxu1 %v1165_v1  ;;  %v115_v55 = vld [vmem:[#allocation6 + $0x120] sm:$0xff]  ;;  %v225_v58 = vld [vmem:[#allocation6 + $0x490] sm:$0xff] }
  0x61   :  { %1252 = vmatprep.subr.bf16.mxu0 %v1251_v63  ;;  %v208_v63 = vld [vmem:[#allocation6 + $0x408] sm:$0xff]  ;;  %v1167_v3 = vpack.c.bf16 %v102_v62, %v100_v61  ;;  %v230_v62 = vld [vmem:[#allocation6 + $0x4b8] sm:$0xff]  ;;  %v227_v1 = vld [vmem:[#allocation6 + $0x4a0] sm:$0xff] }
  0x62   :  { %v1275_v6 = vpack.c.bf16 %v210_v0, %v208_v63  ;;  %v228_v61 = vld [vmem:[#allocation6 + $0x4a8] sm:$0xff]  ;;  %v1185_v63 = vpack.c.bf16 %v117_v56, %v115_v55  ;;  %v1293_v0 = vpack.c.bf16 %v225_v58, %v223_v53  ;;  %v234_v10 = vld [vmem:[#allocation6 + $0x4d8] sm:$0xff]  ;;  %v233_v14 = vld [vmem:[#allocation6 + $0x4d0] sm:$0xff] }
  0x63   :  { %1168 = vmatprep.subr.bf16.mxu1 %v1167_v3  ;;  %v119_v3 = vld [vmem:[#allocation6 + $0x140] sm:$0xff]  ;;  %v232_v9 = vld [vmem:[#allocation6 + $0x4c8] sm:$0xff]  ;;  %v125_v17 = vld [vmem:[#allocation6 + $0x170] sm:$0xff] }
  0x64   :  { %1254 = vmatpush1.bf16.msra.mxu0 %v1253_v4  ;;  %v99_v4 = vld [vmem:[#allocation6 + $0xa0] sm:$0xff]  ;;  %v238_v23 = vld [vmem:[#allocation6 + $0x4f8] sm:$0xff]  ;;  %v129_v29 = vld [vmem:[#allocation6 + $0x190] sm:$0xff] }
  0x65   :  { %1256 = vmatprep.subr.bf16.mxu0 %v1255_v5  ;;  %v101_v5 = vld [vmem:[#allocation6 + $0xb0] sm:$0xff]  ;;  %v235_v26 = vld [vmem:[#allocation6 + $0x4e0] sm:$0xff]  ;;  %v240_v34 = vld [vmem:[#allocation6 + $0x508] sm:$0xff] }
  0x66   :  { %v1169_v15 = vpack.c.bf16 %v101_v5, %v99_v4  ;;  %v121_v4 = vld [vmem:[#allocation6 + $0x150] sm:$0xff]  ;;  %v1295_v5 = vpack.c.bf16 %v230_v62, %v228_v61  ;;  %v239_v38 = vld [vmem:[#allocation6 + $0x500] sm:$0xff]  ;;  %v136_v44 = vld [vmem:[#allocation6 + $0x1c8] sm:$0xff] }
  0x67   :  { %v241_v43 = vld [vmem:[#allocation6 + $0x510] sm:$0xff]  ;;  %v243_v50 = vld [vmem:[#allocation6 + $0x520] sm:$0xff]  ;;  %v140_v56 = vld [vmem:[#allocation6 + $0x1e8] sm:$0xff] }
  0x68   :  { %1258 = vmatpush1.bf16.msra.mxu0 %v1257_v12  ;;  %v106_v12 = vld [vmem:[#allocation6 + $0xd8] sm:$0xff]  ;;  %1170 = vmatpush1.bf16.msra.mxu1 %v1169_v15  ;;  %v1309_v49 = vpack.c.bf16 %v241_v43, %v239_v38  ;;  %v137_v53 = vld [vmem:[#allocation6 + $0x1d0] sm:$0xff]  ;;  %v248_v58 = vld [vmem:[#allocation6 + $0x548] sm:$0xff] }
  0x69   :  { %1260 = vmatprep.subr.bf16.mxu0 %v1259_v16  ;;  %v1277_v16 = vpack.c.bf16 %v209_v8, %v207_v7  ;;  %v1171_v22 = vpack.c.bf16 %v106_v12, %v104_v11  ;;  %v124_v7 = vld [vmem:[#allocation6 + $0x168] sm:$0xff]  ;;  %v126_v8 = vld [vmem:[#allocation6 + $0x178] sm:$0xff]  ;;  %v231_v11 = vld [vmem:[#allocation6 + $0x4c0] sm:$0xff]  ;;  %v1189_v12 = vpack.c.bf16 %v121_v4, %v119_v3 }
  0x6a   :  { %v1191_v15 = vpack.c.bf16 %v126_v8, %v124_v7  ;;  %v1301_v25 = vpack.c.bf16 %v233_v14, %v231_v11  ;;  %v245_v55 = vld [vmem:[#allocation6 + $0x530] sm:$0xff]  ;;  %v247_v62 = vld [vmem:[#allocation6 + $0x540] sm:$0xff]  ;;  %v643_v4 = vld [vmem:[#allocation8 + $0x8] sm:$0xff] }
  0x6b   :  { %1172 = vmatprep.subr.bf16.mxu1 %v1171_v22  ;;  %v236_v22 = vld [vmem:[#allocation6 + $0x4e8] sm:$0xff]  ;;  %v1313_v61 = vpack.c.bf16 %v245_v55, %v243_v50  ;;  %v249_v3 = vld [vmem:[#allocation6 + $0x550] sm:$0xff]  ;;  %v254_v7 = vld [vmem:[#allocation6 + $0x578] sm:$0xff] }
  0x6c   :  { %1262 = vmatpush1.bf16.msra.mxu0 %v1261_v27  ;;  %v1173_v27 = vpack.c.bf16 %v105_v19, %v103_v18  ;;  %v1299_v18 = vpack.c.bf16 %v234_v10, %v232_v9  ;;  %v128_v19 = vld [vmem:[#allocation6 + $0x188] sm:$0xff]  ;;  %v1317_v9 = vpack.c.bf16 %v249_v3, %v247_v62  ;;  %v251_v10 = vld [vmem:[#allocation6 + $0x560] sm:$0xff]  ;;  %v270_v43 = vld [vmem:[#allocation6 + $0x5f8] sm:$0xff] }
  0x6d   :  { %1264 = vmatprep.subr.bf16.mxu0 %v1263_v31  ;;  %v107_v31 = vld [vmem:[#allocation6 + $0xe0] sm:$0xff]  ;;  %v278_v55 = vld [vmem:[#allocation6 + $0x638] sm:$0xff]  ;;  %v280_v62 = vld [vmem:[#allocation6 + $0x648] sm:$0xff] }
  0x6e   :  { %1174 = vmatpush1.bf16.msra.mxu1 %v1173_v27  ;;  %v1177_v39 = vpack.c.bf16 %v109_v32, %v107_v31  ;;  %v237_v31 = vld [vmem:[#allocation6 + $0x4f0] sm:$0xff]  ;;  %v132_v32 = vld [vmem:[#allocation6 + $0x1a8] sm:$0xff] }
  0x6f   :  { %1176 = vmatprep.subr.bf16.mxu1 %v1175_v30  ;;  %v1303_v30 = vpack.c.bf16 %v238_v23, %v236_v22  ;;  %v1305_v37 = vpack.c.bf16 %v237_v31, %v235_v26  ;;  %v281_v3 = vld [vmem:[#allocation6 + $0x650] sm:$0xff] }
  0x70   :  { %1266 = vmatpush1.bf16.msra.mxu0 %v1265_v42  ;;  %v1179_v42 = vpack.c.bf16 %v114_v36, %v112_v35  ;;  %v242_v35 = vld [vmem:[#allocation6 + $0x518] sm:$0xff] }
  0x71   :  { %1268 = vmatprep.subr.bf16.mxu0 %v1267_v46  ;;  %v221_v46 = vld [vmem:[#allocation6 + $0x470] sm:$0xff] }
  0x72   :  { %1178 = vmatpush1.bf16.msra.mxu1 %v1177_v39  ;;  %v1289_v52 = vpack.c.bf16 %v221_v46, %v219_v41  ;;  %v133_v41 = vld [vmem:[#allocation6 + $0x1b0] sm:$0xff]  ;;  %v244_v46 = vld [vmem:[#allocation6 + $0x528] sm:$0xff] }
  0x73   :  { %1180 = vmatprep.subr.bf16.mxu1 %v1179_v42  ;;  %v1307_v42 = vpack.c.bf16 %v242_v35, %v240_v34  ;;  %v259_v34 = vld [vmem:[#allocation6 + $0x5a0] sm:$0xff]  ;;  %v261_v35 = vld [vmem:[#allocation6 + $0x5b0] sm:$0xff] }
  0x74   :  { %1270 = vmatpush1.bf16.msra.mxu0 %v1269_v54  ;;  %v1183_v54 = vpack.c.bf16 %v118_v48, %v116_v47  ;;  %v246_v47 = vld [vmem:[#allocation6 + $0x538] sm:$0xff]  ;;  %v1329_v38 = vpack.c.bf16 %v261_v35, %v259_v34  ;;  %v304_v34 = vld [vmem:[#allocation6 + $0x708] sm:$0xff] }
  0x75   :  { %1272 = vmatprep.subr.bf16.mxu0 %v1271_v59  ;;  %v120_v59 = vld [vmem:[#allocation6 + $0x148] sm:$0xff]  ;;  %v306_v35 = vld [vmem:[#allocation6 + $0x718] sm:$0xff] }
  0x76   :  { %1182 = vmatpush1.bf16.msra.mxu1 %v1181_v51 }
  0x77   :  { %1184 = vmatprep.subr.bf16.mxu1 %v1183_v54  ;;  %v1311_v54 = vpack.c.bf16 %v246_v47, %v244_v46  ;;  %v267_v46 = vld [vmem:[#allocation6 + $0x5e0] sm:$0xff]  ;;  %v269_v47 = vld [vmem:[#allocation6 + $0x5f0] sm:$0xff] }
  0x78   :  { %1274 = vmatpush1.bf16.msra.mxu0 %v1273_v2  ;;  %v1187_v2 = vpack.c.bf16 %v122_v60, %v120_v59  ;;  %v250_v59 = vld [vmem:[#allocation6 + $0x558] sm:$0xff]  ;;  %v1337_v50 = vpack.c.bf16 %v269_v47, %v267_v46  ;;  %v312_v46 = vld [vmem:[#allocation6 + $0x748] sm:$0xff] }
  0x79   :  { %1276 = vmatprep.subr.bf16.mxu0 %v1275_v6  ;;  %v229_v6 = vld [vmem:[#allocation6 + $0x4b0] sm:$0xff]  ;;  %v314_v47 = vld [vmem:[#allocation6 + $0x758] sm:$0xff] }
  0x7a   :  { %1186 = vmatpush1.bf16.msra.mxu1 %v1185_v63 }
  0x7b   :  { %483 = vmatmul.mubr.f32.vlgmr.msra.gmra.mrb[0].mxu0 %v73_v13  ;;  %v1297_v13 = vpack.c.bf16 %v229_v6, %v227_v1  ;;  %1188 = vmatprep.subr.bf16.mxu1 %v1187_v2  ;;  %v141_v1 = vld [vmem:[#allocation6 + $0x1f0] sm:$0xff]  ;;  %v1315_v2 = vpack.c.bf16 %v250_v59, %v248_v58  ;;  %v252_v6 = vld [vmem:[#allocation6 + $0x568] sm:$0xff]  ;;  %v275_v59 = vld [vmem:[#allocation6 + $0x620] sm:$0xff] }
  0x7c   :  { %1278 = vmatpush1.bf16.msra.mxu0 %v1277_v16  ;;  %553 = vmatprep.mubr.f32.mxu0 %v76_v21  ;;  %v123_v16 = vld [vmem:[#allocation6 + $0x160] sm:$0xff]  ;;  %v72_v21 = vld [vmem:[#allocation3 + $0x8] sm:$0xff]  ;;  %v1319_v14 = vpack.c.bf16 %v254_v7, %v252_v6 }
  0x7d   :  { %1280 = vmatprep.subr.bf16.mxu0 %v1279_v20  ;;  %v130_v20 = vld [vmem:[#allocation6 + $0x198] sm:$0xff]  ;;  %411 = vmatprep.mubr.f32.mxu1 %v72_v21  ;;  %v1193_v24 = vpack.c.bf16 %v125_v17, %v123_v16  ;;  %v659_v16 = vld [vmem:[#allocation8 + $0x88] sm:$0xff] }
  0x7e   :  { %1190 = vmatpush1.bf16.msra.mxu1 %v1189_v12  ;;  %v1195_v27 = vpack.c.bf16 %v130_v20, %v128_v19  ;;  %v642_v12 = vld [vmem:[#allocation8] sm:$0xff]  ;;  %v667_v17 = vld [vmem:[#allocation8 + $0xc8] sm:$0xff]  ;;  %v258_v19 = vld [vmem:[#allocation6 + $0x598] sm:$0xff] }
  0x7f   :  { %1192 = vmatprep.subr.bf16.mxu1 %v1191_v15  ;;  %v253_v15 = vld [vmem:[#allocation6 + $0x570] sm:$0xff]  ;;  %v71_v20 = vld [vmem:[#allocation3] sm:$0xff]  ;;  %v1407_v23 = vpack.c.bf16 %v667_v17, %v659_v16  ;;  %v292_v16 = vld [vmem:[#allocation6 + $0x6a8] sm:$0xff] }
  0x80   :  { %1282 = vmatpush1.bf16.msra.mxu0 %v1281_v28  ;;  %v127_v28 = vld [vmem:[#allocation6 + $0x180] sm:$0xff]  ;;  %v1321_v22 = vpack.c.bf16 %v253_v15, %v251_v10  ;;  %v288_v10 = vld [vmem:[#allocation6 + $0x688] sm:$0xff]  ;;  %v289_v15 = vld [vmem:[#allocation6 + $0x690] sm:$0xff] }
  0x81   :  { %1284 = vmatprep.subr.bf16.mxu0 %v1283_v33  ;;  %v134_v33 = vld [vmem:[#allocation6 + $0x1b8] sm:$0xff]  ;;  %v1197_v36 = vpack.c.bf16 %v129_v29, %v127_v28  ;;  %v257_v28 = vld [vmem:[#allocation6 + $0x590] sm:$0xff]  ;;  %v260_v29 = vld [vmem:[#allocation6 + $0x5a8] sm:$0xff] }
  0x82   :  { %1194 = vmatpush1.bf16.msra.mxu1 %v1193_v24  ;;  %v1199_v39 = vpack.c.bf16 %v134_v33, %v132_v32  ;;  %v658_v24 = vld [vmem:[#allocation8 + $0x80] sm:$0xff]  ;;  %v294_v17 = vld [vmem:[#allocation6 + $0x6b8] sm:$0xff] }
  0x83   :  { %1196 = vmatprep.subr.bf16.mxu1 %v1195_v27  ;;  %v255_v27 = vld [vmem:[#allocation6 + $0x580] sm:$0xff] }
  0x84   :  { %1286 = vmatpush1.bf16.msra.mxu0 %v1285_v40  ;;  %v131_v40 = vld [vmem:[#allocation6 + $0x1a0] sm:$0xff]  ;;  %v1325_v32 = vpack.c.bf16 %v257_v28, %v255_v27  ;;  %v297_v27 = vld [vmem:[#allocation6 + $0x6d0] sm:$0xff]  ;;  %v300_v28 = vld [vmem:[#allocation6 + $0x6e8] sm:$0xff] }
  0x85   :  { %1288 = vmatprep.subr.bf16.mxu0 %v1287_v45  ;;  %v138_v45 = vld [vmem:[#allocation6 + $0x1d8] sm:$0xff]  ;;  %v1201_v48 = vpack.c.bf16 %v133_v41, %v131_v40  ;;  %v263_v40 = vld [vmem:[#allocation6 + $0x5c0] sm:$0xff]  ;;  %v265_v41 = vld [vmem:[#allocation6 + $0x5d0] sm:$0xff] }
  0x86   :  { %1198 = vmatpush1.bf16.msra.mxu1 %v1197_v36  ;;  %v1203_v51 = vpack.c.bf16 %v138_v45, %v136_v44  ;;  %v264_v36 = vld [vmem:[#allocation6 + $0x5c8] sm:$0xff]  ;;  %v1333_v44 = vpack.c.bf16 %v265_v41, %v263_v40  ;;  %v310_v41 = vld [vmem:[#allocation6 + $0x738] sm:$0xff] }
  0x87   :  { %1200 = vmatprep.subr.bf16.mxu1 %v1199_v39  ;;  %v308_v40 = vld [vmem:[#allocation6 + $0x728] sm:$0xff] }
  0x88   :  { %1290 = vmatpush1.bf16.msra.mxu0 %v1289_v52  ;;  %v135_v52 = vld [vmem:[#allocation6 + $0x1c0] sm:$0xff] }
  0x89   :  { %1292 = vmatprep.subr.bf16.mxu0 %v1291_v57  ;;  %v142_v57 = vld [vmem:[#allocation6 + $0x1f8] sm:$0xff]  ;;  %v1205_v60 = vpack.c.bf16 %v137_v53, %v135_v52  ;;  %v271_v52 = vld [vmem:[#allocation6 + $0x600] sm:$0xff]  ;;  %v273_v53 = vld [vmem:[#allocation6 + $0x610] sm:$0xff] }
  0x8a   :  { %1202 = vmatpush1.bf16.msra.mxu1 %v1201_v48  ;;  %v1207_v63 = vpack.c.bf16 %v142_v57, %v140_v56  ;;  %v272_v48 = vld [vmem:[#allocation6 + $0x608] sm:$0xff]  ;;  %v75_v56 = vld [vmem:[#allocation3 + $0x20] sm:$0xff]  ;;  %v1341_v57 = vpack.c.bf16 %v273_v53, %v271_v52  ;;  %v318_v53 = vld [vmem:[#allocation6 + $0x778] sm:$0xff] }
  0x8b   :  { %1204 = vmatprep.subr.bf16.mxu1 %v1203_v51  ;;  %v316_v52 = vld [vmem:[#allocation6 + $0x768] sm:$0xff] }
  0x8c   :  { %1294 = vmatpush1.bf16.msra.mxu0 %v1293_v0  ;;  %v139_v0 = vld [vmem:[#allocation6 + $0x1e0] sm:$0xff] }
  0x8d   :  { %1296 = vmatprep.subr.bf16.mxu0 %v1295_v5  ;;  %v651_v5 = vld [vmem:[#allocation8 + $0x48] sm:$0xff]  ;;  %v1209_v8 = vpack.c.bf16 %v141_v1, %v139_v0 }
  0x8e   :  { %1206 = vmatpush1.bf16.msra.mxu1 %v1205_v60  ;;  %v1403_v11 = vpack.c.bf16 %v651_v5, %v643_v4  ;;  %v277_v60 = vld [vmem:[#allocation6 + $0x630] sm:$0xff]  ;;  %v284_v4 = vld [vmem:[#allocation6 + $0x668] sm:$0xff]  ;;  %v286_v5 = vld [vmem:[#allocation6 + $0x678] sm:$0xff] }
  0x8f   :  { %1208 = vmatprep.subr.bf16.mxu1 %v1207_v63  ;;  %v282_v63 = vld [vmem:[#allocation6 + $0x658] sm:$0xff]  ;;  %v1345_v0 = vpack.c.bf16 %v277_v60, %v275_v59  ;;  %v1351_v7 = vpack.c.bf16 %v286_v5, %v284_v4  ;;  %v323_v4 = vld [vmem:[#allocation6 + $0x7a0] sm:$0xff]  ;;  %v325_v5 = vld [vmem:[#allocation6 + $0x7b0] sm:$0xff] }
  0x90   :  { %1298 = vmatpush1.bf16.msra.mxu0 %v1297_v13  ;;  %v650_v13 = vld [vmem:[#allocation8 + $0x40] sm:$0xff]  ;;  %v1347_v1 = vpack.c.bf16 %v282_v63, %v280_v62  ;;  %v322_v59 = vld [vmem:[#allocation6 + $0x798] sm:$0xff]  ;;  %v321_v63 = vld [vmem:[#allocation6 + $0x790] sm:$0xff] }
  0x91   :  { %1300 = vmatprep.subr.bf16.mxu0 %v1299_v18  ;;  %v256_v18 = vld [vmem:[#allocation6 + $0x588] sm:$0xff]  ;;  %v1405_v21 = vpack.c.bf16 %v650_v13, %v642_v12  ;;  %v319_v62 = vld [vmem:[#allocation6 + $0x780] sm:$0xff] }
  0x92   :  { %1210 = vmatpush1.bf16.msra.mxu1 %v1209_v8  ;;  %v1323_v26 = vpack.c.bf16 %v258_v19, %v256_v18  ;;  %v283_v8 = vld [vmem:[#allocation6 + $0x660] sm:$0xff]  ;;  %v1359_v19 = vpack.c.bf16 %v294_v17, %v292_v16  ;;  %v333_v17 = vld [vmem:[#allocation6 + $0x7f0] sm:$0xff] }
  0x93   :  { %1404 = vmatprep.subr.bf16.mxu1 %v1403_v11  ;;  %v290_v11 = vld [vmem:[#allocation6 + $0x698] sm:$0xff]  ;;  %v331_v16 = vld [vmem:[#allocation6 + $0x7e0] sm:$0xff] }
  0x94   :  { %1302 = vmatpush1.bf16.msra.mxu0 %v1301_v25  ;;  %v666_v25 = vld [vmem:[#allocation8 + $0xc0] sm:$0xff]  ;;  %v1355_v13 = vpack.c.bf16 %v290_v11, %v288_v10  ;;  %v329_v11 = vld [vmem:[#allocation6 + $0x7d0] sm:$0xff] }
  0x95   :  { %1304 = vmatprep.subr.bf16.mxu0 %v1303_v30  ;;  %v262_v30 = vld [vmem:[#allocation6 + $0x5b8] sm:$0xff]  ;;  %412 = vmatmul.mubr.f32.vlgmr.msra.gmra.mrb[0].mxu1 %v71_v20  ;;  %v1409_v31 = vpack.c.bf16 %v666_v25, %v658_v24  ;;  %v291_v20 = vld [vmem:[#allocation6 + $0x6a0] sm:$0xff] }
  0x96   :  { %1406 = vmatpush1.bf16.msra.mxu1 %v1405_v21  ;;  %v1327_v33 = vpack.c.bf16 %v262_v30, %v260_v29  ;;  %v293_v21 = vld [vmem:[#allocation6 + $0x6b0] sm:$0xff]  ;;  %v302_v29 = vld [vmem:[#allocation6 + $0x6f8] sm:$0xff]  ;;  %v327_v10 = vld [vmem:[#allocation6 + $0x7c0] sm:$0xff] }
  0x97   :  { %1408 = vmatprep.subr.bf16.mxu1 %v1407_v23  ;;  %v298_v23 = vld [vmem:[#allocation6 + $0x6d8] sm:$0xff]  ;;  %v1361_v24 = vpack.c.bf16 %v293_v21, %v291_v20  ;;  %v675_v20 = vld [vmem:[#allocation8 + $0x108] sm:$0xff] }
  0x98   :  { %1306 = vmatpush1.bf16.msra.mxu0 %v1305_v37  ;;  %v266_v37 = vld [vmem:[#allocation6 + $0x5d8] sm:$0xff]  ;;  %v683_v21 = vld [vmem:[#allocation8 + $0x148] sm:$0xff] }
  0x99   :  { %1308 = vmatprep.subr.bf16.mxu0 %v1307_v42  ;;  %v1331_v39 = vpack.c.bf16 %v266_v37, %v264_v36  ;;  %v268_v42 = vld [vmem:[#allocation6 + $0x5e8] sm:$0xff]  ;;  %v1371_v37 = vpack.c.bf16 %v306_v35, %v304_v34  ;;  %v706_v35 = vld [vmem:[#allocation8 + $0x200] sm:$0xff] }
  0x9a   :  { %1410 = vmatpush1.bf16.msra.mxu1 %v1409_v31  ;;  %v1335_v45 = vpack.c.bf16 %v270_v43, %v268_v42  ;;  %v1367_v31 = vpack.c.bf16 %v302_v29, %v300_v28  ;;  %v1375_v43 = vpack.c.bf16 %v310_v41, %v308_v40  ;;  %v690_v29 = vld [vmem:[#allocation8 + $0x180] sm:$0xff] }
  0x9b   :  { %v722_v41 = vld [vmem:[#allocation8 + $0x280] sm:$0xff] }
  0x9c   :  { %1310 = vmatpush1.bf16.msra.mxu0 %v1309_v49  ;;  %v274_v49 = vld [vmem:[#allocation6 + $0x618] sm:$0xff] }
  0x9d   :  { %1312 = vmatprep.subr.bf16.mxu0 %v1311_v54  ;;  %v1339_v51 = vpack.c.bf16 %v274_v49, %v272_v48  ;;  %v276_v54 = vld [vmem:[#allocation6 + $0x628] sm:$0xff]  ;;  %v1379_v49 = vpack.c.bf16 %v314_v47, %v312_v46  ;;  %v738_v46 = vld [vmem:[#allocation8 + $0x300] sm:$0xff] }
  0x9e   :  { %v1343_v58 = vpack.c.bf16 %v278_v55, %v276_v54  ;;  %v1383_v55 = vpack.c.bf16 %v318_v53, %v316_v52  ;;  %v746_v47 = vld [vmem:[#allocation8 + $0x340] sm:$0xff] }
  0x9f   :  { %v1429_v52 = vpack.c.bf16 %v746_v47, %v738_v46  ;;  %v724_v47 = vld [vmem:[#allocation8 + $0x290] sm:$0xff] }
  0xa0   :  { %1314 = vmatpush1.bf16.msra.mxu0 %v1313_v61  ;;  %v78_v61 = vld [vmem:[#allocation3 + $0x38] sm:$0xff] }
  0xa1   :  { %1316 = vmatprep.subr.bf16.mxu0 %v1315_v2  ;;  %v279_v2 = vld [vmem:[#allocation6 + $0x640] sm:$0xff] }
  0xa2   :  { %v1349_v6 = vpack.c.bf16 %v281_v3, %v279_v2  ;;  %v1389_v2 = vpack.c.bf16 %v321_v63, %v319_v62  ;;  %v337_v62 = vlaneseq }
  0xa4   :  { %1318 = vmatpush1.bf16.msra.mxu0 %v1317_v9  ;;  %v285_v9 = vld [vmem:[#allocation6 + $0x670] sm:$0xff]  ;;  %v1785_v63 = vshrl.u32 %v337_v62, 7  ;;  %v647_v62 = vld [vmem:[#allocation8 + $0x28] sm:$0xff] }
  0xa5   :  { %1320 = vmatprep.subr.bf16.mxu0 %v1319_v14  ;;  %v1353_v12 = vpack.c.bf16 %v285_v9, %v283_v8  ;;  %v287_v14 = vld [vmem:[#allocation6 + $0x680] sm:$0xff]  ;;  %v1393_v8 = vpack.c.bf16 %v325_v5, %v323_v4 }
  0xa6   :  { %v1357_v18 = vpack.c.bf16 %v289_v15, %v287_v14  ;;  %v1397_v14 = vpack.c.bf16 %v329_v11, %v327_v10 }
  0xa8   :  { %1322 = vmatpush1.bf16.msra.mxu0 %v1321_v22  ;;  %v296_v22 = vld [vmem:[#allocation6 + $0x6c8] sm:$0xff] }
  0xa9   :  { %1324 = vmatprep.subr.bf16.mxu0 %v1323_v26  ;;  %v1363_v25 = vpack.c.bf16 %v298_v23, %v296_v22  ;;  %v295_v26 = vld [vmem:[#allocation6 + $0x6c0] sm:$0xff]  ;;  %v1411_v23 = vpack.c.bf16 %v683_v21, %v675_v20 }
  0xaa   :  { %v1365_v30 = vpack.c.bf16 %v297_v27, %v295_v26  ;;  %v674_v22 = vld [vmem:[#allocation8 + $0x100] sm:$0xff]  ;;  %v691_v26 = vld [vmem:[#allocation8 + $0x188] sm:$0xff] }
  0xab   :  { %1412 = vmatprep.subr.bf16.mxu1 %v1411_v23  ;;  %v699_v27 = vld [vmem:[#allocation8 + $0x1c8] sm:$0xff]  ;;  %v660_v23 = vld [vmem:[#allocation8 + $0x90] sm:$0xff] }
  0xac   :  { %1326 = vmatpush1.bf16.msra.mxu0 %v1325_v32  ;;  %v299_v32 = vld [vmem:[#allocation6 + $0x6e0] sm:$0xff]  ;;  %v1415_v28 = vpack.c.bf16 %v699_v27, %v691_v26  ;;  %v685_v26 = vld [vmem:[#allocation8 + $0x158] sm:$0xff] }
  0xad   :  { %1328 = vmatprep.subr.bf16.mxu0 %v1327_v33  ;;  %v301_v33 = vld [vmem:[#allocation6 + $0x6f0] sm:$0xff] }
  0xae   :  { %v1369_v36 = vpack.c.bf16 %v301_v33, %v299_v32  ;;  %v707_v32 = vld [vmem:[#allocation8 + $0x208] sm:$0xff] }
  0xaf   :  { %v715_v33 = vld [vmem:[#allocation8 + $0x248] sm:$0xff] }
  0xb0   :  { %1330 = vmatpush1.bf16.msra.mxu0 %v1329_v38  ;;  %v303_v38 = vld [vmem:[#allocation6 + $0x700] sm:$0xff]  ;;  %v1419_v34 = vpack.c.bf16 %v715_v33, %v707_v32  ;;  %v701_v32 = vld [vmem:[#allocation8 + $0x1d8] sm:$0xff] }
  0xb1   :  { %1332 = vmatprep.subr.bf16.mxu0 %v1331_v39  ;;  %v305_v39 = vld [vmem:[#allocation6 + $0x710] sm:$0xff] }
  0xb2   :  { %v1373_v42 = vpack.c.bf16 %v305_v39, %v303_v38  ;;  %v723_v38 = vld [vmem:[#allocation8 + $0x288] sm:$0xff] }
  0xb3   :  { %v731_v39 = vld [vmem:[#allocation8 + $0x2c8] sm:$0xff] }
  0xb4   :  { %1334 = vmatpush1.bf16.msra.mxu0 %v1333_v44  ;;  %v307_v44 = vld [vmem:[#allocation6 + $0x720] sm:$0xff]  ;;  %v1423_v40 = vpack.c.bf16 %v731_v39, %v723_v38  ;;  %v717_v38 = vld [vmem:[#allocation8 + $0x258] sm:$0xff] }
  0xb5   :  { %1336 = vmatprep.subr.bf16.mxu0 %v1335_v45  ;;  %v309_v45 = vld [vmem:[#allocation6 + $0x730] sm:$0xff] }
  0xb6   :  { %v1377_v48 = vpack.c.bf16 %v309_v45, %v307_v44  ;;  %v747_v45 = vld [vmem:[#allocation8 + $0x348] sm:$0xff] }
  0xb8   :  { %1338 = vmatpush1.bf16.msra.mxu0 %v1337_v50  ;;  %v311_v50 = vld [vmem:[#allocation6 + $0x740] sm:$0xff] }
  0xb9   :  { %1340 = vmatprep.subr.bf16.mxu0 %v1339_v51  ;;  %v313_v51 = vld [vmem:[#allocation6 + $0x750] sm:$0xff] }
  0xba   :  { %v1381_v54 = vpack.c.bf16 %v313_v51, %v311_v50  ;;  %v755_v50 = vld [vmem:[#allocation8 + $0x388] sm:$0xff] }
  0xbb   :  { %554 = vmatmul.mubr.f32.vlgmr.msra.gmra.mrb[0].mxu0 %v75_v56  ;;  %v315_v56 = vld [vmem:[#allocation6 + $0x760] sm:$0xff]  ;;  %v763_v51 = vld [vmem:[#allocation8 + $0x3c8] sm:$0xff] }
  0xbc   :  { %1342 = vmatpush1.bf16.msra.mxu0 %v1341_v57  ;;  %624 = vmatprep.mubr.f32.mxu0 %v78_v61  ;;  %v317_v57 = vld [vmem:[#allocation6 + $0x770] sm:$0xff]  ;;  %v1431_v53 = vpack.c.bf16 %v763_v51, %v755_v50  ;;  %v741_v50 = vld [vmem:[#allocation8 + $0x318] sm:$0xff] }
  0xbd   :  { %1344 = vmatprep.subr.bf16.mxu0 %v1343_v58  ;;  %v320_v58 = vld [vmem:[#allocation6 + $0x788] sm:$0xff]  ;;  %v1385_v60 = vpack.c.bf16 %v317_v57, %v315_v56  ;;  %v645_v56 = vld [vmem:[#allocation8 + $0x18] sm:$0xff] }
  0xbe   :  { %v1387_v61 = vpack.c.bf16 %v322_v59, %v320_v58  ;;  %v653_v57 = vld [vmem:[#allocation8 + $0x58] sm:$0xff] }
  0xbf   :  { %v1435_v59 = vpack.c.bf16 %v653_v57, %v645_v56  ;;  %v749_v51 = vld [vmem:[#allocation8 + $0x358] sm:$0xff] }
  0xc0   :  { %1346 = vmatpush1.bf16.msra.mxu0 %v1345_v0  ;;  %v324_v0 = vld [vmem:[#allocation6 + $0x7a8] sm:$0xff]  ;;  %v757_v56 = vld [vmem:[#allocation8 + $0x398] sm:$0xff] }
  0xc1   :  { %1348 = vmatprep.subr.bf16.mxu0 %v1347_v1  ;;  %v326_v1 = vld [vmem:[#allocation6 + $0x7b8] sm:$0xff] }
  0xc2   :  { %v1391_v3 = vpack.c.bf16 %v326_v1, %v324_v0  ;;  %v339_v0 = vsub.s32 0, %v1785_v63  ;;  %v335_v1 = vld [vmem:[%s1860_s2] sm:$0x3]  ;;  %v765_v57 = vld [vmem:[#allocation8 + $0x3d8] sm:$0xff] }
  0xc4   :  { %1350 = vmatpush1.bf16.msra.mxu0 %v1349_v6  ;;  %v328_v6 = vld [vmem:[#allocation6 + $0x7c8] sm:$0xff] }
  0xc5   :  { %1352 = vmatprep.subr.bf16.mxu0 %v1351_v7  ;;  %v330_v7 = vld [vmem:[#allocation6 + $0x7d8] sm:$0xff] }
  0xc6   :  { %v1395_v9 = vpack.c.bf16 %v330_v7, %v328_v6 }
  0xc8   :  { %1354 = vmatpush1.bf16.msra.mxu0 %v1353_v12  ;;  %v332_v12 = vld [vmem:[#allocation6 + $0x7e8] sm:$0xff] }
  0xc9   :  { %1356 = vmatprep.subr.bf16.mxu0 %v1355_v13  ;;  %v334_v13 = vld [vmem:[#allocation6 + $0x7f8] sm:$0xff] }
  0xca   :  { %v1399_v15 = vpack.c.bf16 %v334_v13, %v332_v12  ;;  %v636_v13 = vld [vmem:[%s1861_s3] sm:$0xff]  ;;  %s1700_s3 = smov [#allocation10]  }
  0xcb   :  { %s1120_s23 = sshll.u32 %s1700_s3, 4  ;;  %s1121_s23 = int_to_ptr.vmem [resolvable:$true] %s1120_s23 }
  0xcc   :  { %1358 = vmatpush1.bf16.msra.mxu0 %v1357_v18  ;;  %v1401_v18 = vpack.c.bf16 %v333_v17, %v331_v16  ;;  %v661_v17 = vld [vmem:[#allocation8 + $0x98] sm:$0xff]  ;;  %s1618_s26 = scalar_lea.vmem %s1121_s23, 128  ;;  %p1623_p11 = scmp.lt.s32.totalorder %s1121_s23, %s1121_s23 }
  0xcd   :  { %1360 = vmatprep.subr.bf16.mxu0 %v1359_v19  ;;  %v77_v19 = vld [vmem:[#allocation3 + $0x30] sm:$0xff]  ;;  %p1619_p10 = scmp.ne.s32.totalorder %s1121_s23, %s1618_s26  ;;  %p1624_p12 = scmp.lt.s32.totalorder %s1618_s26, %s1618_s26 }
  0xcf   :  { %p1625_p13 = por %p1624_p12, %p1623_p11 }
  0xd0   :  { %1362 = vmatpush1.bf16.msra.mxu0 %v1361_v24  ;;  %v682_v24 = vld [vmem:[#allocation8 + $0x140] sm:$0xff] }
  0xd1   :  { %1364 = vmatprep.subr.bf16.mxu0 %v1363_v25  ;;  %v1413_v25 = vpack.c.bf16 %v682_v24, %v674_v22  ;;  %v668_v24 = vld [vmem:[#allocation8 + $0xd0] sm:$0xff]  ;;  %p1626_p0 = pnand %p1625_p13, %p1619_p10 }
  0xd2   :  { %v1441_v27 = vpack.c.bf16 %v668_v24, %v660_v23  ;;  %v694_v24 = vld [vmem:[#allocation8 + $0x1a0] sm:$0xff] }
  0xd3   :  { %1414 = vmatpush1.bf16.msra.mxu1 %v1413_v25  ;;  %v677_v25 = vld [vmem:[#allocation8 + $0x118] sm:$0xff] }
  0xd4   :  { %1366 = vmatpush1.bf16.msra.mxu0 %v1365_v30  ;;  %v698_v30 = vld [vmem:[#allocation8 + $0x1c0] sm:$0xff]  ;;  %1416 = vmatprep.subr.bf16.mxu1 %v1415_v28  ;;  %v1443_v28 = vpack.c.bf16 %v685_v26, %v677_v25  ;;  %v711_v26 = vld [vmem:[#allocation8 + $0x228] sm:$0xff] }
  0xd5   :  { %1368 = vmatprep.subr.bf16.mxu0 %v1367_v31  ;;  %v1417_v31 = vpack.c.bf16 %v698_v30, %v690_v29  ;;  %v676_v29 = vld [vmem:[#allocation8 + $0x110] sm:$0xff]  ;;  %v702_v25 = vld [vmem:[#allocation8 + $0x1e0] sm:$0xff] }
  0xd6   :  { %v684_v30 = vld [vmem:[#allocation8 + $0x150] sm:$0xff] }
  0xd7   :  { %1418 = vmatpush1.bf16.msra.mxu1 %v1417_v31  ;;  %v693_v31 = vld [vmem:[#allocation8 + $0x198] sm:$0xff]  ;;  %v1445_v33 = vpack.c.bf16 %v684_v30, %v676_v29  ;;  %v710_v30 = vld [vmem:[#allocation8 + $0x220] sm:$0xff] }
  0xd8   :  { %1370 = vmatpush1.bf16.msra.mxu0 %v1369_v36  ;;  %v714_v36 = vld [vmem:[#allocation8 + $0x240] sm:$0xff]  ;;  %1420 = vmatprep.subr.bf16.mxu1 %v1419_v34  ;;  %v1447_v34 = vpack.c.bf16 %v701_v32, %v693_v31  ;;  %v727_v32 = vld [vmem:[#allocation8 + $0x2a8] sm:$0xff] }
  0xd9   :  { %1372 = vmatprep.subr.bf16.mxu0 %v1371_v37  ;;  %v1421_v37 = vpack.c.bf16 %v714_v36, %v706_v35  ;;  %v692_v35 = vld [vmem:[#allocation8 + $0x190] sm:$0xff]  ;;  %v718_v31 = vld [vmem:[#allocation8 + $0x260] sm:$0xff] }
  0xda   :  { %v700_v36 = vld [vmem:[#allocation8 + $0x1d0] sm:$0xff] }
  0xdb   :  { %1422 = vmatpush1.bf16.msra.mxu1 %v1421_v37  ;;  %v709_v37 = vld [vmem:[#allocation8 + $0x218] sm:$0xff]  ;;  %v1449_v39 = vpack.c.bf16 %v700_v36, %v692_v35  ;;  %v726_v36 = vld [vmem:[#allocation8 + $0x2a0] sm:$0xff] }
  0xdc   :  { %1374 = vmatpush1.bf16.msra.mxu0 %v1373_v42  ;;  %v730_v42 = vld [vmem:[#allocation8 + $0x2c0] sm:$0xff]  ;;  %1424 = vmatprep.subr.bf16.mxu1 %v1423_v40  ;;  %v1451_v40 = vpack.c.bf16 %v717_v38, %v709_v37  ;;  %v743_v38 = vld [vmem:[#allocation8 + $0x328] sm:$0xff] }
  0xdd   :  { %1376 = vmatprep.subr.bf16.mxu0 %v1375_v43  ;;  %v739_v43 = vld [vmem:[#allocation8 + $0x308] sm:$0xff]  ;;  %v1425_v44 = vpack.c.bf16 %v730_v42, %v722_v41  ;;  %v708_v41 = vld [vmem:[#allocation8 + $0x210] sm:$0xff]  ;;  %v734_v37 = vld [vmem:[#allocation8 + $0x2e0] sm:$0xff] }
  0xde   :  { %v716_v42 = vld [vmem:[#allocation8 + $0x250] sm:$0xff] }
  0xdf   :  { %1426 = vmatpush1.bf16.msra.mxu1 %v1425_v44  ;;  %v733_v44 = vld [vmem:[#allocation8 + $0x2d8] sm:$0xff] }
  0xe0   :  { %1378 = vmatpush1.bf16.msra.mxu0 %v1377_v48  ;;  %v1699_v48 = vmov 0.0  }
  0xe1   :  { %1380 = vmatprep.subr.bf16.mxu0 %v1379_v49  ;;  %876 = vmatprep.mubr.f32.mxu1 %v1699_v48  ;;  %v1427_v49 = vpack.c.bf16 %v747_v45, %v739_v43  ;;  %v725_v43 = vld [vmem:[#allocation8 + $0x298] sm:$0xff]  ;;  %v1453_v45 = vpack.c.bf16 %v716_v42, %v708_v41  ;;  %v742_v42 = vld [vmem:[#allocation8 + $0x320] sm:$0xff] }
  0xe2   :  { %v1455_v46 = vpack.c.bf16 %v733_v44, %v725_v43  ;;  %v750_v43 = vld [vmem:[#allocation8 + $0x360] sm:$0xff]  ;;  %v759_v44 = vld [vmem:[#allocation8 + $0x3a8] sm:$0xff] }
  0xe3   :  { %1428 = vmatprep.subr.bf16.mxu1 %v1427_v49  ;;  %v732_v49 = vld [vmem:[#allocation8 + $0x2d0] sm:$0xff] }
  0xe4   :  { %1382 = vmatpush1.bf16.msra.mxu0 %v1381_v54  ;;  %v754_v54 = vld [vmem:[#allocation8 + $0x380] sm:$0xff]  ;;  %1430 = vmatpush1.bf16.msra.mxu1 %v1429_v52  ;;  %v1457_v52 = vpack.c.bf16 %v732_v49, %v724_v47 }
  0xe5   :  { %1384 = vmatprep.subr.bf16.mxu0 %v1383_v55  ;;  %v762_v55 = vld [vmem:[#allocation8 + $0x3c0] sm:$0xff]  ;;  %1432 = vmatprep.subr.bf16.mxu1 %v1431_v53  ;;  %v1459_v53 = vpack.c.bf16 %v749_v51, %v741_v50  ;;  %v649_v51 = vld [vmem:[#allocation8 + $0x38] sm:$0xff] }
  0xe6   :  { %v1433_v58 = vpack.c.bf16 %v762_v55, %v754_v54  ;;  %v740_v54 = vld [vmem:[#allocation8 + $0x310] sm:$0xff]  ;;  %v758_v49 = vld [vmem:[#allocation8 + $0x3a0] sm:$0xff] }
  0xe7   :  { %v748_v55 = vld [vmem:[#allocation8 + $0x350] sm:$0xff]  ;;  %v766_v50 = vld [vmem:[#allocation8 + $0x3e0] sm:$0xff] }
  0xe8   :  { %1386 = vmatpush1.bf16.msra.mxu0 %v1385_v60  ;;  %1434 = vmatpush1.bf16.msra.mxu1 %v1433_v58  ;;  %v1461_v58 = vpack.c.bf16 %v748_v55, %v740_v54  ;;  %v648_v55 = vld [vmem:[#allocation8 + $0x30] sm:$0xff] }
  0xe9   :  { %1388 = vmatprep.subr.bf16.mxu0 %v1387_v61  ;;  %1436 = vmatprep.subr.bf16.mxu1 %v1435_v59  ;;  %v1463_v59 = vpack.c.bf16 %v765_v57, %v757_v56  ;;  %v656_v56 = vld [vmem:[#allocation8 + $0x70] sm:$0xff]  ;;  %v665_v57 = vld [vmem:[#allocation8 + $0xb8] sm:$0xff] }
  0xec   :  { %1390 = vmatpush1.bf16.msra.mxu0 %v1389_v2  ;;  %v343_v2 = vsub.s32 1, %v1785_v63 }
  0xed   :  { %1392 = vmatprep.subr.bf16.mxu0 %v1391_v3  ;;  %v340_v3 = vrot.slane %v335_v1, %v339_v0 }
  0xee   :  { %v344_v4 = vrot.slane %v335_v1, %v343_v2  ;;  %v655_v1 = vld [vmem:[#allocation8 + $0x68] sm:$0xff] }
  0xf0   :  { %1394 = vmatpush1.bf16.msra.mxu0 %v1393_v8 }
  0xf1   :  { %1396 = vmatprep.subr.bf16.mxu0 %v1395_v9 }
  0xf4   :  { %1398 = vmatpush1.bf16.msra.mxu0 %v1397_v14  ;;  %v644_v14 = vld [vmem:[#allocation8 + $0x10] sm:$0xff] }
  0xf5   :  { %1400 = vmatprep.subr.bf16.mxu0 %v1399_v15  ;;  %v652_v15 = vld [vmem:[#allocation8 + $0x50] sm:$0xff] }
  0xf6   :  { %v1437_v20 = vpack.c.bf16 %v652_v15, %v644_v14  ;;  %v687_v14 = vld [vmem:[#allocation8 + $0x168] sm:$0xff] }
  0xf8   :  { %1402 = vmatpush1.bf16.msra.mxu0 %v1401_v18  ;;  %v669_v18 = vld [vmem:[#allocation8 + $0xd8] sm:$0xff] }
  0xf9   :  { %v1439_v22 = vpack.c.bf16 %v669_v18, %v661_v17  ;;  %v678_v17 = vld [vmem:[#allocation8 + $0x120] sm:$0xff] }
  0xfa   :  { %v686_v18 = vld [vmem:[#allocation8 + $0x160] sm:$0xff] }
  0xfb   :  { %625 = vmatmul.mubr.f32.vlgmr.msra.gmra.mrb[0].mxu0 %v77_v19 }
 0x168   :  { %v413_v60 = vpop.f32.mrb[0].mxu1 }
 0x169   :  { %v415_v61 = vpop.f32.mrb[1].mxu1  ;;  %v414_v5 = vadd.f32 %v413_v60, %v340_v3  ;;  %v756_v60 = vld [vmem:[#allocation8 + $0x390] sm:$0xff] }
 0x16a   :  { %v416_v6 = vadd.f32 %v415_v61, %v344_v4  ;;  %v764_v61 = vld [vmem:[#allocation8 + $0x3d0] sm:$0xff]  ;;  %v1467_v4 = vpack.c.bf16 %v655_v1, %v647_v62  ;;  %v681_v1 = vld [vmem:[#allocation8 + $0x138] sm:$0xff] }
 0x16b   :  { %v1465_v3 = vpack.c.bf16 %v764_v61, %v756_v60  ;;  %v664_v61 = vld [vmem:[#allocation8 + $0xb0] sm:$0xff] }
 0x16c   :  { %v672_v62 = vld [vmem:[#allocation8 + $0xf0] sm:$0xff] }
 0x1ce   :  { %v626_v7 = vpop.f32.mrb[0].mxu0 }
 0x1cf   :  { %v1532_v8 = vadd.f32 %v626_v7, %v414_v5  ;;  %v628_v9 = vpop.f32.mrb[1].mxu0  ;;  %v646_v5 = vld [vmem:[#allocation8 + $0x20] sm:$0xff]  ;;  %v663_v7 = vld [vmem:[#allocation8 + $0xa8] sm:$0xff] }
 0x1d0   :  { %v1534_v10 = vadd.f32 %v628_v9, %v416_v6  ;;  %v654_v6 = vld [vmem:[#allocation8 + $0x60] sm:$0xff] }
 0x1d1   :  { %631 = vst [vmem:[#allocation9] sm:$0xff] %v1532_v8  ;;  %v1469_v9 = vpack.c.bf16 %v654_v6, %v646_v5  ;;  %v680_v6 = vld [vmem:[#allocation8 + $0x130] sm:$0xff] }
 0x1d2   :  { %632 = vst [vmem:[#allocation9 + $0x8] sm:$0xff] %v1534_v10  ;;  %v633_v11 = vmul.f32 0.5, %v1534_v10 }
 0x1d4   :  { %v634_v12 = vmul.f32 1.442695, %v633_v11  ;;  %v662_v11 = vld [vmem:[#allocation8 + $0xa0] sm:$0xff] }
 0x1d6   :  { %1550 = vpow2.f32 %v634_v12  ;;  %v670_v12 = vld [vmem:[#allocation8 + $0xe0] sm:$0xff] }
 0x1d7   :  { %v1473_v15 = vpack.c.bf16 %v670_v12, %v662_v11  ;;  %v696_v12 = vld [vmem:[#allocation8 + $0x1b0] sm:$0xff] }
 0x1e0   :  { %v1551_v16 = vpop.eup %1550 }
 0x1e1   :  { %v637_v19 = vmul.f32 %v1551_v16, %v636_v13  ;;  %v679_v13 = vld [vmem:[#allocation8 + $0x128] sm:$0xff] }
 0x1e2   :  { %v1475_v16 = vpack.c.bf16 %v687_v14, %v679_v13  ;;  %v704_v13 = vld [vmem:[#allocation8 + $0x1f0] sm:$0xff]  ;;  %v713_v14 = vld [vmem:[#allocation8 + $0x238] sm:$0xff] }
 0x1e3   :  { %v1799_v21 = vadd.f32 %v1532_v8, %v637_v19  ;;  %v671_v8 = vld [vmem:[#allocation8 + $0xe8] sm:$0xff] }
 0x1e4   :  { %v1471_v10 = vpack.c.bf16 %v671_v8, %v663_v7  ;;  %v695_v19 = vld [vmem:[#allocation8 + $0x1a8] sm:$0xff]  ;;  %v688_v7 = vld [vmem:[#allocation8 + $0x170] sm:$0xff]  ;;  %v697_v8 = vld [vmem:[#allocation8 + $0x1b8] sm:$0xff] }
 0x1e5   :  { %877 = vmatmul.mubr.f32.vlgmr.msra.gmra.mrb[2].mxu1 %v1799_v21  ;;  %639 = vst [vmem:[#allocation10] sm:$0xff] %v1799_v21 }
 0x1e6   :  { %1438 = vmatpush1.bf16.msra.mxu1 %v1437_v20  ;;  %947 = vmatprep.mubr.f32.mxu1 %v1699_v48  ;;  %v703_v20 = vld [vmem:[#allocation8 + $0x1e8] sm:$0xff] }
 0x1e7   :  { %1440 = vmatprep.subr.bf16.mxu1 %v1439_v22  ;;  %v1477_v22 = vpack.c.bf16 %v686_v18, %v678_v17  ;;  %v1479_v23 = vpack.c.bf16 %v703_v20, %v695_v19  ;;  %v712_v18 = vld [vmem:[#allocation8 + $0x230] sm:$0xff]  ;;  %v729_v19 = vld [vmem:[#allocation8 + $0x2b8] sm:$0xff] }
 0x1e8   :  { %v737_v20 = vld [vmem:[#allocation8 + $0x2f8] sm:$0xff] }
 0x1ea   :  { %1442 = vmatpush1.bf16.msra.mxu1 %v1441_v27  ;;  %v719_v27 = vld [vmem:[#allocation8 + $0x268] sm:$0xff] }
 0x1eb   :  { %1444 = vmatprep.subr.bf16.mxu1 %v1443_v28  ;;  %v1481_v28 = vpack.c.bf16 %v702_v25, %v694_v24  ;;  %v1483_v29 = vpack.c.bf16 %v719_v27, %v711_v26  ;;  %v728_v24 = vld [vmem:[#allocation8 + $0x2b0] sm:$0xff]  ;;  %v745_v26 = vld [vmem:[#allocation8 + $0x338] sm:$0xff] }
 0x1ec   :  { %v736_v25 = vld [vmem:[#allocation8 + $0x2f0] sm:$0xff]  ;;  %v753_v27 = vld [vmem:[#allocation8 + $0x378] sm:$0xff] }
 0x1ee   :  { %1446 = vmatpush1.bf16.msra.mxu1 %v1445_v33  ;;  %v735_v33 = vld [vmem:[#allocation8 + $0x2e8] sm:$0xff] }
 0x1ef   :  { %1448 = vmatprep.subr.bf16.mxu1 %v1447_v34  ;;  %v1485_v34 = vpack.c.bf16 %v718_v31, %v710_v30  ;;  %v1487_v35 = vpack.c.bf16 %v735_v33, %v727_v32  ;;  %v744_v30 = vld [vmem:[#allocation8 + $0x330] sm:$0xff]  ;;  %v761_v32 = vld [vmem:[#allocation8 + $0x3b8] sm:$0xff] }
 0x1f0   :  { %v752_v31 = vld [vmem:[#allocation8 + $0x370] sm:$0xff]  ;;  %v769_v33 = vld [vmem:[#allocation8 + $0x3f8] sm:$0xff] }
 0x1f2   :  { %1450 = vmatpush1.bf16.msra.mxu1 %v1449_v39  ;;  %v751_v39 = vld [vmem:[#allocation8 + $0x368] sm:$0xff] }
 0x1f3   :  { %1452 = vmatprep.subr.bf16.mxu1 %v1451_v40  ;;  %v1489_v40 = vpack.c.bf16 %v734_v37, %v726_v36  ;;  %v1491_v41 = vpack.c.bf16 %v751_v39, %v743_v38  ;;  %v760_v36 = vld [vmem:[#allocation8 + $0x3b0] sm:$0xff] }
 0x1f4   :  { %v768_v37 = vld [vmem:[#allocation8 + $0x3f0] sm:$0xff] }
 0x1f5   :  { %v1529_v38 = vpack.c.bf16 %v768_v37, %v760_v36 }
 0x1f6   :  { %1454 = vmatpush1.bf16.msra.mxu1 %v1453_v45  ;;  %v767_v45 = vld [vmem:[#allocation8 + $0x3e8] sm:$0xff] }
 0x1f7   :  { %1456 = vmatprep.subr.bf16.mxu1 %v1455_v46  ;;  %v1493_v46 = vpack.c.bf16 %v750_v43, %v742_v42  ;;  %v1495_v47 = vpack.c.bf16 %v767_v45, %v759_v44 }
 0x1fa   :  { %1458 = vmatpush1.bf16.msra.mxu1 %v1457_v52  ;;  %v657_v52 = vld [vmem:[#allocation8 + $0x78] sm:$0xff] }
 0x1fb   :  { %1460 = vmatprep.subr.bf16.mxu1 %v1459_v53  ;;  %v1497_v53 = vpack.c.bf16 %v766_v50, %v758_v49  ;;  %v1499_v54 = vpack.c.bf16 %v657_v52, %v649_v51 }
 0x1fe   :  { %1462 = vmatpush1.bf16.msra.mxu1 %v1461_v58  ;;  %v673_v58 = vld [vmem:[#allocation8 + $0xf8] sm:$0xff] }
 0x1ff   :  { %1464 = vmatprep.subr.bf16.mxu1 %v1463_v59  ;;  %v1501_v59 = vpack.c.bf16 %v656_v56, %v648_v55  ;;  %v1503_v60 = vpack.c.bf16 %v673_v58, %v665_v57 }
 0x202   :  { %1466 = vmatpush1.bf16.msra.mxu1 %v1465_v3  ;;  %v689_v3 = vld [vmem:[#allocation8 + $0x178] sm:$0xff] }
 0x203   :  { %1468 = vmatprep.subr.bf16.mxu1 %v1467_v4  ;;  %v1505_v4 = vpack.c.bf16 %v672_v62, %v664_v61  ;;  %v1507_v5 = vpack.c.bf16 %v689_v3, %v681_v1 }
 0x205   :  { %948 = vmatmul.mubr.f32.vlgmr.msra.gmra.mrb[4].mxu1 %v1799_v21 }
 0x206   :  { %1470 = vmatpush1.bf16.msra.mxu1 %v1469_v9  ;;  %1018 = vmatprep.mubr.f32.mxu1 %v1699_v48  ;;  %v705_v9 = vld [vmem:[#allocation8 + $0x1f8] sm:$0xff] }
 0x207   :  { %1472 = vmatprep.subr.bf16.mxu1 %v1471_v10  ;;  %v1509_v10 = vpack.c.bf16 %v688_v7, %v680_v6  ;;  %v1511_v11 = vpack.c.bf16 %v705_v9, %v697_v8 }
 0x20a   :  { %1474 = vmatpush1.bf16.msra.mxu1 %v1473_v15  ;;  %v721_v15 = vld [vmem:[#allocation8 + $0x278] sm:$0xff] }
 0x20b   :  { %1476 = vmatprep.subr.bf16.mxu1 %v1475_v16  ;;  %v1513_v16 = vpack.c.bf16 %v704_v13, %v696_v12  ;;  %v1515_v17 = vpack.c.bf16 %v721_v15, %v713_v14 }
 0x20e   :  { %1478 = vmatpush1.bf16.msra.mxu1 %v1477_v22 }
 0x20f   :  { %1480 = vmatprep.subr.bf16.mxu1 %v1479_v23  ;;  %v1519_v23 = vpack.c.bf16 %v737_v20, %v729_v19 }
 0x212   :  { %1482 = vmatpush1.bf16.msra.mxu1 %v1481_v28  ;;  %v1521_v28 = vpack.c.bf16 %v736_v25, %v728_v24 }
 0x213   :  { %1484 = vmatprep.subr.bf16.mxu1 %v1483_v29  ;;  %v1523_v29 = vpack.c.bf16 %v753_v27, %v745_v26 }
 0x216   :  { %1486 = vmatpush1.bf16.msra.mxu1 %v1485_v34  ;;  %v1525_v34 = vpack.c.bf16 %v752_v31, %v744_v30 }
 0x217   :  { %1488 = vmatprep.subr.bf16.mxu1 %v1487_v35  ;;  %v1527_v35 = vpack.c.bf16 %v769_v33, %v761_v32 }
 0x21a   :  { %1490 = vmatpush1.bf16.msra.mxu1 %v1489_v40 }
 0x21b   :  { %1492 = vmatprep.subr.bf16.mxu1 %v1491_v41 }
 0x21e   :  { %1494 = vmatpush1.bf16.msra.mxu1 %v1493_v46 }
 0x21f   :  { %1496 = vmatprep.subr.bf16.mxu1 %v1495_v47 }
 0x222   :  { %1498 = vmatpush1.bf16.msra.mxu1 %v1497_v53 }
 0x223   :  { %1500 = vmatprep.subr.bf16.mxu1 %v1499_v54 }
 0x225   :  { %1019 = vmatmul.mubr.f32.vlgmr.msra.gmra.mrb[6].mxu1 %v1799_v21 }
 0x226   :  { %1502 = vmatpush1.bf16.msra.mxu1 %v1501_v59  ;;  %1089 = vmatprep.mubr.f32.mxu1 %v1699_v48  ;;  %v720_v48 = vld [vmem:[#allocation8 + $0x270] sm:$0xff] }
 0x227   :  { %1504 = vmatprep.subr.bf16.mxu1 %v1503_v60  ;;  %v1517_v22 = vpack.c.bf16 %v720_v48, %v712_v18 }
 0x22a   :  { %1506 = vmatpush1.bf16.msra.mxu1 %v1505_v4 }
 0x22b   :  { %1508 = vmatprep.subr.bf16.mxu1 %v1507_v5 }
 0x22e   :  { %1510 = vmatpush1.bf16.msra.mxu1 %v1509_v10 }
 0x22f   :  { %1512 = vmatprep.subr.bf16.mxu1 %v1511_v11 }
 0x232   :  { %1514 = vmatpush1.bf16.msra.mxu1 %v1513_v16 }
 0x233   :  { %1516 = vmatprep.subr.bf16.mxu1 %v1515_v17 }
 0x236   :  { %1518 = vmatpush1.bf16.msra.mxu1 %v1517_v22 }
 0x237   :  { %1520 = vmatprep.subr.bf16.mxu1 %v1519_v23 }
 0x23a   :  { %1522 = vmatpush1.bf16.msra.mxu1 %v1521_v28 }
 0x23b   :  { %1524 = vmatprep.subr.bf16.mxu1 %v1523_v29 }
 0x23e   :  { %1526 = vmatpush1.bf16.msra.mxu1 %v1525_v34 }
 0x23f   :  { %1528 = vmatprep.subr.bf16.mxu1 %v1527_v35 }
 0x242   :  { %1530 = vmatpush1.bf16.msra.mxu1 %v1529_v38 }
 0x245   :  { %1090 = vmatmul.mubr.f32.vlgmr.msra.gmra.mrb[8].mxu1 %v1799_v21 }
 0x246   :  { %1629 = shalt.err (!%p1626_p0)
}
 0x247   :  { %s1630_s30 = scalar_lea.hbm %s1865_s7, 128 }
 0x248   :  { %p1631_p1 = scmp.ne.s32.totalorder %s1865_s7, %s1630_s30  ;;  %p1634_p2 = scmp.lt.u32.totalorder %s1630_s30, %s1865_s7 }
 0x24a   :  { %p1636_p3 = pnand %p1634_p2, %p1631_p1 }
 0x24c   :  { %1639 = shalt.err (!%p1636_p3)
}
 0x24d   :  { %1123 = dma.vmem_to_hbm [thread:$0]  %s1121_s23, 128, %s1865_s7, [#allocation11]  }
 0x24e   :  { %s1640_s13 = scalar_lea.vmem %s1111_s25, 256  ;;  %p1645_p5 = scmp.lt.s32.totalorder %s1111_s25, %s1111_s25 }
 0x24f   :  { %p1641_p4 = scmp.ne.s32.totalorder %s1111_s25, %s1640_s13  ;;  %p1646_p6 = scmp.lt.s32.totalorder %s1640_s13, %s1640_s13 }
 0x251   :  { %p1647_p7 = por %p1646_p6, %p1645_p5 }
 0x253   :  { %p1648_p8 = pnand %p1647_p7, %p1641_p4 }
 0x255   :  { %1651 = shalt.err (!%p1648_p8)
}
 0x256   :  { %s1652_s16 = scalar_lea.hbm %s1864_s6, 256 }
 0x257   :  { %p1653_p9 = scmp.ne.s32.totalorder %s1864_s6, %s1652_s16  ;;  %p1656_p10 = scmp.lt.u32.totalorder %s1652_s16, %s1864_s6 }
 0x259   :  { %p1658_p11 = pnand %p1656_p10, %p1653_p9 }
 0x25b   :  { %1661 = shalt.err (!%p1658_p11)
}
 0x25c   :  { %1113 = dma.vmem_to_hbm [thread:$0]  %s1111_s25, 256, %s1864_s6, [#allocation5]   ;;  %v770_v21 = vld [vmem:[%s1863_s5] sm:$0xff]  ;;  %v782_v45 = vsub.s32 2, %v1785_v63  ;;  %v786_v46 = vsub.s32 3, %v1785_v63  ;;  %v798_v60 = vsub.s32 6, %v1785_v63 }
 0x25d   :  { %v775_v39 = vrot.slane %v770_v21, %v339_v0  ;;  %v779_v40 = vrot.slane %v770_v21, %v343_v2  ;;  %v790_v0 = vsub.s32 4, %v1785_v63  ;;  %v794_v2 = vsub.s32 5, %v1785_v63  ;;  %s1702_s5 = smov [#allocation12]  }
 0x25e   :  { %v783_v47 = vrot.slane %v770_v21, %v782_v45  ;;  %v787_v49 = vrot.slane %v770_v21, %v786_v46  ;;  %v802_v61 = vsub.s32 7, %v1785_v63  ;;  %v799_v62 = vrot.slane %v770_v21, %v798_v60  ;;  %s1130_s6 = sshll.u32 %s1702_s5, 4  ;;  %s1131_s6 = int_to_ptr.vmem [resolvable:$true] %s1130_s6 }
 0x25f   :  { %v791_v54 = vrot.slane %v770_v21, %v790_v0  ;;  %v795_v55 = vrot.slane %v770_v21, %v794_v2  ;;  %s1662_s2 = scalar_lea.vmem %s1131_s6, 1024  ;;  %p1667_p13 = scmp.lt.s32.totalorder %s1131_s6, %s1131_s6 }
 0x260   :  { %v803_v1 = vrot.slane %v770_v21, %v802_v61  ;;  %p1663_p12 = scmp.ne.s32.totalorder %s1131_s6, %s1662_s2  ;;  %p1668_p0 = scmp.lt.s32.totalorder %s1662_s2, %s1662_s2 }
 0x262   :  { %p1669_p1 = por %p1668_p0, %p1667_p13 }
 0x264   :  { %p1670_p2 = pnand %p1669_p1, %p1663_p12 }
 0x2b8   :  { %v878_v41 = vpop.f32.mrb[2].mxu1 }
 0x2b9   :  { %v879_v42 = vadd.f32 %v878_v41, %v775_v39  ;;  %v880_v43 = vpop.f32.mrb[3].mxu1 }
 0x2ba   :  { %v881_v44 = vadd.f32 %v880_v43, %v779_v40 }
 0x2bb   :  { %1096 = vst [vmem:[#allocation12] sm:$0xff] %v879_v42 }
 0x2bc   :  { %1097 = vst [vmem:[#allocation12 + $0x8] sm:$0xff] %v881_v44 }
 0x2d8   :  { %v949_v50 = vpop.f32.mrb[4].mxu1 }
 0x2d9   :  { %v950_v51 = vadd.f32 %v949_v50, %v783_v47  ;;  %v951_v52 = vpop.f32.mrb[5].mxu1 }
 0x2da   :  { %v952_v53 = vadd.f32 %v951_v52, %v787_v49 }
 0x2db   :  { %1098 = vst [vmem:[#allocation12 + $0x10] sm:$0xff] %v950_v51 }
 0x2dc   :  { %1099 = vst [vmem:[#allocation12 + $0x18] sm:$0xff] %v952_v53 }
 0x2f8   :  { %v1020_v56 = vpop.f32.mrb[6].mxu1 }
 0x2f9   :  { %v1021_v57 = vadd.f32 %v1020_v56, %v791_v54  ;;  %v1022_v58 = vpop.f32.mrb[7].mxu1 }
 0x2fa   :  { %v1023_v59 = vadd.f32 %v1022_v58, %v795_v55 }
 0x2fb   :  { %1100 = vst [vmem:[#allocation12 + $0x20] sm:$0xff] %v1021_v57 }
 0x2fc   :  { %1101 = vst [vmem:[#allocation12 + $0x28] sm:$0xff] %v1023_v59 }
 0x318   :  { %v1091_v3 = vpop.f32.mrb[8].mxu1 }
 0x319   :  { %v1092_v4 = vadd.f32 %v1091_v3, %v799_v62  ;;  %v1093_v5 = vpop.f32.mrb[9].mxu1 }
 0x31a   :  { %v1094_v6 = vadd.f32 %v1093_v5, %v803_v1 }
 0x31b   :  { %1102 = vst [vmem:[#allocation12 + $0x30] sm:$0xff] %v1092_v4 }
 0x31c   :  { %1103 = vst [vmem:[#allocation12 + $0x38] sm:$0xff] %v1094_v6 }
 0x31d   :  { %1673 = shalt.err (!%p1670_p2)
}
 0x31e   :  { %s1674_s23 = scalar_lea.hbm %s1866_s8, 1024 }
 0x31f   :  { %p1675_p3 = scmp.ne.s32.totalorder %s1866_s8, %s1674_s23  ;;  %p1678_p4 = scmp.lt.u32.totalorder %s1674_s23, %s1866_s8 }
 0x321   :  { %p1680_p5 = pnand %p1678_p4, %p1675_p3 }
 0x323   :  { %1683 = shalt.err (!%p1680_p5)
}
 0x324   :  { %1133 = dma.vmem_to_hbm [thread:$0]  %s1131_s6, 1024, %s1866_s8, [#allocation11]  }
 0x325   :  { %1688 = dma.done.wait [#allocation5], 256  }
 0x326   :  { %1689 = vsyncadd [#allocation5], 4294967040 }
 0x327   :  { %1690 = dma.done.wait [#allocation11], 1152  }
 0x328   :  { %1691 = vsyncadd [#allocation11], 4294966144 }
 0x329   :  { %1143 = vsyncpa [#allocation4], 1 }
 0x32a   :  { %1144 = vsyncpa [#allocation7], 1 }
 0x32b   :  { %1145 = vsyncpa [#allocation5], 1 }
 0x32c   :  { %1146 = vsyncpa [#allocation11], 1 }

</bundles_post_ra>
